<compile_context>
chip_gen: v5e
topology: v5e:2x2
jax: 0.10.0
libtpu: 0.0.40
codegen_flags: <defaults>
</compile_context>

<pallas_src>
import math
import functools

import jax
import jax.numpy as jnp
from jax import lax
from jax.experimental import pallas as pl
from jax.experimental.pallas import tpu as pltpu

LN_EPS = 1e-5


# ----------------------------- helpers ------------------------------------ #

def _ln(x, g, b):
    mu = jnp.mean(x, axis=-1, keepdims=True)
    var = jnp.mean((x - mu) ** 2, axis=-1, keepdims=True)
    return (x - mu) * lax.rsqrt(var + LN_EPS) * g + b


def _gelu_exact(x):
    # matches torch.nn.functional.gelu (exact erf form)
    # TODO(synk): if the reference GDformer config uses 'relu' for the conv
    # activation, swap this for jnp.maximum(x, 0).
    return 0.5 * x * (1.0 + lax.erf(x * (1.0 / math.sqrt(2.0))))


def _rep_spec(shape):
    """Full-array block, constant index for every (b, l) grid point."""
    n = len(shape)
    return pl.BlockSpec(tuple(shape), lambda b, l, _n=n: (0,) * _n)


def _batch_spec(shape):
    """Size-1 block along the leading batch axis, constant along the layer axis."""
    n = len(shape)
    return pl.BlockSpec((1,) + tuple(shape[1:]),
                        lambda b, l, _n=n: (b,) + (0,) * (_n - 1))


def _layer_spec(shape):
    """Per-layer block of a layer-stacked weight: only layer l's slice is
    VMEM-resident at grid step (b, l)."""
    n = len(shape)
    return pl.BlockSpec((1,) + tuple(shape[1:]),
                        lambda b, l, _n=n: (l,) + (0,) * (_n - 1))


def _est_vmem_bytes(blocks):
    """Rough VMEM footprint of (block_shape, dtype) pairs, padded to (8, 128)."""
    total = 0
    for shape, dtype in blocks:
        s = [int(d) for d in shape]
        if len(s) < 2:
            s = [1] * (2 - len(s)) + s
        s[-1] = -(-s[-1] // 128) * 128
        s[-2] = -(-s[-2] // 8) * 8
        n = 1
        for d in s:
            n *= d
        total += n * jnp.dtype(dtype).itemsize
    return total


# ------------------------- fused forward kernel ---------------------------- #

def _make_kernel(n_heads, d_model, emit_attn, attn_dtype):
    dh = d_model // n_heads
    scale = 1.0 / math.sqrt(dh)
    bf16 = jnp.bfloat16
    f32 = jnp.float32

    def kernel(x_ref, emb_w_ref, emb_b_ref, pe_ref,
               wqkv_ref, bqkv_ref, wo_ref, bo_ref,
               w1_ref, b1_ref, w2_ref, b2_ref,
               ln1_g_ref, ln1_b_ref, ln2_g_ref, ln2_b_ref,
               norm_g_ref, norm_b_ref, proj_w_ref, proj_b_ref,
               *out_and_scratch):
        if emit_attn:
            out_ref, attn_ref, enc_sc, mu_sc, std_sc = out_and_scratch
        else:
            out_ref, enc_sc, mu_sc, std_sc = out_and_scratch
            attn_ref = None

        l = pl.program_id(1)
        n_layers = pl.num_programs(1)

        # ---- first layer step only: instance-norm over time + embedding ----
        @pl.when(l == 0)
        def _():
            x = x_ref[0]                                      # (L, C) f32
            mu = jnp.mean(x, axis=0, keepdims=True)           # (1, C)
            var = jnp.mean((x - mu) ** 2, axis=0, keepdims=True)
            std = jnp.sqrt(var + 1e-5)
            mu_sc[...] = mu
            std_sc[...] = std
            xn = (x - mu) / std
            # ---- data embedding: value Linear + positional encoding ----
            # TODO(synk): GDformer's DataEmbedding(win_size, enc_in, d_model,
            # ratio) source not provided; approximated as value Linear + PE.
            enc_sc[...] = (jnp.dot(xn.astype(bf16), emb_w_ref[...],
                                   preferred_element_type=f32)
                           + emb_b_ref[...] + pe_ref[...])    # (L, D) f32

        enc = enc_sc[...]                                     # (L, D) f32

        # ---- fused QKV projection: one wide MXU pass ----
        qkv = (jnp.dot(enc.astype(bf16), wqkv_ref[0],
                       preferred_element_type=f32) + bqkv_ref[0])   # (L, 3D)

        # ---- split heads onto a leading batch axis (no minor-dim concat) ----
        heads = range(n_heads)
        q = jnp.stack([qkv[:, h * dh:(h + 1) * dh] for h in heads], axis=0)
        k = jnp.stack([qkv[:, d_model + h * dh:d_model + (h + 1) * dh]
                       for h in heads], axis=0)
        v = jnp.stack([qkv[:, 2 * d_model + h * dh:2 * d_model + (h + 1) * dh]
                       for h in heads], axis=0)               # (H, L, dh)
        qb = (q * scale).astype(bf16)                         # scale folded into q
        kb = k.astype(bf16)
        vb = v.astype(bf16)

        # ---- batched attention over heads: scores (H, L, L) ----
        s = lax.dot_general(qb, kb, (((2,), (2,)), ((0,), (0,))),
                            preferred_element_type=f32)
        s = s - jnp.max(s, axis=-1, keepdims=True)
        p = jnp.exp(s)
        p = p * pl.reciprocal(jnp.sum(p, axis=-1, keepdims=True), approx=True)

        if emit_attn:
            # one batched store per layer instead of H masked per-head stores
            attn_ref[0, 0] = p.astype(attn_dtype)

        # ---- batched context: (H, L, dh) ----
        ctx = lax.dot_general(p.astype(bf16), vb, (((2,), (1,)), ((0,), (0,))),
                              preferred_element_type=f32)
        # ---- head-batched output projection, summed over heads ----
        # new_x = sum_h ctx_h @ Wo[h*dh:(h+1)*dh, :]  ==  concat(ctx_h) @ Wo
        proj = lax.dot_general(ctx.astype(bf16), wo_ref[0],
                               (((2,), (1,)), ((0,), (0,))),
                               preferred_element_type=f32)    # (H, L, D)
        new_x = jnp.sum(proj, axis=0) + bo_ref[0]             # (L, D)

        # ---- residual + norm1 + (conv1 -> gelu -> conv2) + residual + norm2 ----
        x1 = _ln(enc + new_x, ln1_g_ref[0], ln1_b_ref[0])
        y = _gelu_exact(jnp.dot(x1.astype(bf16), w1_ref[0],
                                preferred_element_type=f32) + b1_ref[0])
        y = jnp.dot(y.astype(bf16), w2_ref[0],
                    preferred_element_type=f32) + b2_ref[0]
        enc_sc[...] = _ln(x1 + y, ln2_g_ref[0], ln2_b_ref[0])

        # ---- last layer step: encoder LayerNorm, projection, de-normalization ----
        @pl.when(l == n_layers - 1)
        def _():
            encf = _ln(enc_sc[...], norm_g_ref[...], norm_b_ref[...])
            yout = (jnp.dot(encf.astype(bf16), proj_w_ref[...],
                            preferred_element_type=f32) + proj_b_ref[...])
            # NOTE: at production sizes make enc_in lane-dense (>=128) or pack
            # (L, C) into a lane-dense slab in the wrapper to avoid vst.msk.
            out_ref[0] = yout * std_sc[...] + mu_sc[...]

    return kernel


def encoder_forward(x, params, n_heads, e_layers,
                    return_attns=True, attn_dtype=jnp.float32):
    """x: (B, win_size, enc_in) float32. dropout=0.0 (module default) -> identity.

    Set return_attns=False if the caller does not consume attention maps (skips
    the O(L^2) HBM writeback). Set attn_dtype=jnp.bfloat16 to halve attn
    writeback when f32 parity is not required.
    """
    B, L, C = x.shape
    D = params["emb_w"].shape[1]
    H = n_heads
    kernel = _make_kernel(n_heads, D, return_attns, attn_dtype)

    in_specs = [
        _batch_spec((B, L, C)),
        _rep_spec(params["emb_w"].shape), _rep_spec(params["emb_b"].shape),
        _rep_spec(params["pe"].shape),
        _layer_spec(params["wqkv"].shape), _layer_spec(params["bqkv"].shape),
        _layer_spec(params["wo"].shape), _layer_spec(params["bo"].shape),
        _layer_spec(params["w1"].shape), _layer_spec(params["b1"].shape),
        _layer_spec(params["w2"].shape), _layer_spec(params["b2"].shape),
        _layer_spec(params["ln1_g"].shape), _layer_spec(params["ln1_b"].shape),
        _layer_spec(params["ln2_g"].shape), _layer_spec(params["ln2_b"].shape),
        _rep_spec(params["norm_g"].shape), _rep_spec(params["norm_b"].shape),
        _rep_spec(params["proj_w"].shape), _rep_spec(params["proj_b"].shape),
    ]

    out_spec_main = pl.BlockSpec((1, L, C), lambda b, l: (b, 0, 0))
    if return_attns:
        out_shape = (jax.ShapeDtypeStruct((B, L, C), jnp.float32),
                     jax.ShapeDtypeStruct((B, e_layers, H, L, L), attn_dtype))
        out_specs = (out_spec_main,
                     pl.BlockSpec((1, 1, H, L, L), lambda b, l: (b, l, 0, 0, 0)))
    else:
        out_shape = jax.ShapeDtypeStruct((B, L, C), jnp.float32)
        out_specs = out_spec_main

    scratch_shapes = [
        pltpu.VMEM((L, D), jnp.float32),   # running activation, carried over l
        pltpu.VMEM((1, C), jnp.float32),   # mu  (for de-normalization)
        pltpu.VMEM((1, C), jnp.float32),   # std (for de-normalization)
    ]

    # Explicit scoped-VMEM budget: resident blocks x buffer count + headroom,
    # clamped so it is valid on v5e/v6e (128 MiB) and v7x (64 MiB) alike.
    in_blocks = [((1, L, C), x.dtype)]
    for name in ("emb_w", "emb_b", "pe", "norm_g", "norm_b", "proj_w", "proj_b"):
        p_ = params[name]
        in_blocks.append((p_.shape, p_.dtype))
    for name in ("wqkv", "bqkv", "wo", "bo", "w1", "b1", "w2", "b2",
                 "ln1_g", "ln1_b", "ln2_g", "ln2_b"):
        p_ = params[name]
        in_blocks.append(((1,) + tuple(p_.shape[1:]), p_.dtype))
    out_blocks = [((1, L, C), jnp.float32)]
    if return_attns:
        out_blocks.append(((1, 1, H, L, L), attn_dtype))
    scr_blocks = [((L, D), jnp.float32), ((1, C), jnp.float32), ((1, C), jnp.float32)]
    est = (2 * _est_vmem_bytes(in_blocks) + 2 * _est_vmem_bytes(out_blocks)
           + _est_vmem_bytes(scr_blocks))
    vmem_limit = int(min(64 * 2**20, max(24 * 2**20, 1.5 * est + (2 << 20))))
    # NOTE: a further v7x option is pipeline_mode=pl.Buffered(1) on the
    # constant-index (_rep_spec) weight blocks — their index never changes, so
    # double-buffering buys no overlap and only doubles their VMEM footprint.

    result = pl.pallas_call(
        kernel,
        out_shape=out_shape,
        grid=(B, e_layers),
        in_specs=in_specs,
        out_specs=out_specs,
        scratch_shapes=scratch_shapes,
        compiler_params=pltpu.CompilerParams(
            dimension_semantics=("parallel", "arbitrary"),
            vmem_limit_bytes=vmem_limit),
    )(x, params["emb_w"], params["emb_b"], params["pe"],
      params["wqkv"], params["bqkv"], params["wo"], params["bo"],
      params["w1"], params["b1"], params["w2"], params["b2"],
      params["ln1_g"], params["ln1_b"], params["ln2_g"], params["ln2_b"],
      params["norm_g"], params["norm_b"], params["proj_w"], params["proj_b"])

    if return_attns:
        out, attn_all = result
        attns = [attn_all[:, l] for l in range(e_layers)]
    else:
        out = result
        attns = []
    # TODO(synk): GDformer's prototype similarity loss (num_proto / len_map)
    # source not provided; sim_ls kept at zeros (matches accumulating zeros).
    sim_ls = jnp.zeros((B, L), jnp.float32)
    return out, attns, sim_ls


# ------------------------------ params ------------------------------------- #

def sinusoidal_pe(L, D):
    pos = jnp.arange(L, dtype=jnp.float32)[:, None]
    div = jnp.exp(jnp.arange(0, D, 2, dtype=jnp.float32) * (-math.log(10000.0) / D))
    pe = jnp.zeros((L, D), jnp.float32)
    pe = pe.at[:, 0::2].set(jnp.sin(pos * div))
    pe = pe.at[:, 1::2].set(jnp.cos(pos * div))
    return pe


def init_params(key, enc_in, d_model, d_ff, e_layers, n_heads, win_size):
    dh = d_model // n_heads

    def dense(k, fan_in, fan_out):
        kw, kb = jax.random.split(k)
        w = jax.random.normal(kw, (fan_in, fan_out), jnp.float32) * 0.02
        b = jax.random.normal(kb, (1, fan_out), jnp.float32) * 0.02
        return w, b

    keys = jax.random.split(key, 2 + e_layers)
    emb_w, emb_b = dense(keys[0], enc_in, d_model)
    proj_w, proj_b = dense(keys[1], d_model, enc_in)

    wqkv, bqkv, wo, bo, w1, b1, w2, b2 = ([] for _ in range(8))
    for l in range(e_layers):
        lk = jax.random.split(keys[2 + l], 6)
        wq, bq_ = dense(lk[0], d_model, d_model)
        wk, bk_ = dense(lk[1], d_model, d_model)
        wv, bv_ = dense(lk[2], d_model, d_model)
        wo_l, bo_l = dense(lk[3], d_model, d_model)
        w1_l, b1_l = dense(lk[4], d_model, d_ff)   # conv1 (kernel_size=1)
        w2_l, b2_l = dense(lk[5], d_ff, d_model)   # conv2 (kernel_size=1)
        wqkv.append(jnp.concatenate([wq, wk, wv], axis=1))     # fused QKV weight
        bqkv.append(jnp.concatenate([bq_, bk_, bv_], axis=1))
        # out-proj weight pre-split per head: (H, dh, D) row blocks of Wo
        wo.append(wo_l.reshape(n_heads, dh, d_model))
        bo.append(bo_l)
        w1.append(w1_l); b1.append(b1_l)
        w2.append(w2_l); b2.append(b2_l)

    stack = lambda xs: jnp.stack(xs, axis=0)
    to_bf16 = lambda a: a.astype(jnp.bfloat16)     # matmul weights fed as bf16

    return dict(
        emb_w=to_bf16(emb_w), emb_b=emb_b,
        pe=sinusoidal_pe(win_size, d_model),
        wqkv=to_bf16(stack(wqkv)), bqkv=stack(bqkv),
        wo=to_bf16(stack(wo)), bo=stack(bo),
        w1=to_bf16(stack(w1)), b1=stack(b1),
        w2=to_bf16(stack(w2)), b2=stack(b2),
        ln1_g=jnp.ones((e_layers, 1, d_model), jnp.float32),
        ln1_b=jnp.zeros((e_layers, 1, d_model), jnp.float32),
        ln2_g=jnp.ones((e_layers, 1, d_model), jnp.float32),
        ln2_b=jnp.zeros((e_layers, 1, d_model), jnp.float32),
        norm_g=jnp.ones((1, d_model), jnp.float32),
        norm_b=jnp.zeros((1, d_model), jnp.float32),
        proj_w=to_bf16(proj_w), proj_b=proj_b)


# --------------------------------- main ------------------------------------ #

if __name__ == "__main__":
    # small shapes consistent with the module
    B, win_size, enc_in = 2, 16, 8
    d_model, n_heads, e_layers, d_ff = 32, 4, 2, 64

    key = jax.random.PRNGKey(0)
    kx, kp = jax.random.split(key)
    x = jax.random.normal(kx, (B, win_size, enc_in), jnp.float32)
    params = init_params(kp, enc_in, d_model, d_ff, e_layers, n_heads, win_size)

    fwd = jax.jit(functools.partial(encoder_forward,
                                    n_heads=n_heads, e_layers=e_layers))
    out, attns, sim_ls = fwd(x, params)
    jax.block_until_ready((out, attns, sim_ls))

    assert out.shape == (B, win_size, enc_in)
    assert sim_ls.shape == (B, win_size)
    assert len(attns) == e_layers
    assert attns[0].shape == (B, n_heads, win_size, win_size)
    assert bool(jnp.isfinite(out).all())
    assert bool(jnp.isfinite(attns[0]).all())
    print("KERNEL_OK")
</pallas_src>

<mosaic_0001>
module attributes {stable_mosaic.version = 11 : i64} {
  func.func @kernel(%arg0: i32, %arg1: i32, %arg2: memref<1x16x8xf32, #tpu.memory_space<vmem>>, %arg3: memref<8x32xbf16, #tpu.memory_space<vmem>>, %arg4: memref<1x32xf32, #tpu.memory_space<vmem>>, %arg5: memref<16x32xf32, #tpu.memory_space<vmem>>, %arg6: memref<1x32x96xbf16, #tpu.memory_space<vmem>>, %arg7: memref<1x1x96xf32, #tpu.memory_space<vmem>>, %arg8: memref<1x4x8x32xbf16, #tpu.memory_space<vmem>>, %arg9: memref<1x1x32xf32, #tpu.memory_space<vmem>>, %arg10: memref<1x32x64xbf16, #tpu.memory_space<vmem>>, %arg11: memref<1x1x64xf32, #tpu.memory_space<vmem>>, %arg12: memref<1x64x32xbf16, #tpu.memory_space<vmem>>, %arg13: memref<1x1x32xf32, #tpu.memory_space<vmem>>, %arg14: memref<1x1x32xf32, #tpu.memory_space<vmem>>, %arg15: memref<1x1x32xf32, #tpu.memory_space<vmem>>, %arg16: memref<1x1x32xf32, #tpu.memory_space<vmem>>, %arg17: memref<1x1x32xf32, #tpu.memory_space<vmem>>, %arg18: memref<1x32xf32, #tpu.memory_space<vmem>>, %arg19: memref<1x32xf32, #tpu.memory_space<vmem>>, %arg20: memref<32x8xbf16, #tpu.memory_space<vmem>>, %arg21: memref<1x8xf32, #tpu.memory_space<vmem>>, %arg22: memref<1x16x8xf32, #tpu.memory_space<vmem>>, %arg23: memref<1x1x4x16x16xf32, #tpu.memory_space<vmem>>, %arg24: memref<16x32xf32, #tpu.memory_space<vmem>>, %arg25: memref<1x8xf32, #tpu.memory_space<vmem>>, %arg26: memref<1x8xf32, #tpu.memory_space<vmem>>) attributes {dimension_semantics = [#tpu.dimension_semantics<parallel>, #tpu.dimension_semantics<arbitrary>], iteration_bounds = array<i64: 2, 2>, scalar_prefetch = 0 : i64, scratch_operands = 3 : i64, tpu.core_type = #tpu.core_type<tc>, window_params = [{transform_indices = @transform_0, window_bounds = array<i64: 1, 16, 8>}, {pipeline_mode = #tpu.pipeline_mode<synchronous>, transform_indices = @transform_1, window_bounds = array<i64: 8, 32>}, {pipeline_mode = #tpu.pipeline_mode<synchronous>, transform_indices = @transform_2, window_bounds = array<i64: 1, 32>}, {pipeline_mode = #tpu.pipeline_mode<synchronous>, transform_indices = @transform_3, window_bounds = array<i64: 16, 32>}, {transform_indices = @transform_4, window_bounds = array<i64: 1, 32, 96>}, {transform_indices = @transform_5, window_bounds = array<i64: 1, 1, 96>}, {transform_indices = @transform_6, window_bounds = array<i64: 1, 4, 8, 32>}, {transform_indices = @transform_7, window_bounds = array<i64: 1, 1, 32>}, {transform_indices = @transform_8, window_bounds = array<i64: 1, 32, 64>}, {transform_indices = @transform_9, window_bounds = array<i64: 1, 1, 64>}, {transform_indices = @transform_10, window_bounds = array<i64: 1, 64, 32>}, {transform_indices = @transform_11, window_bounds = array<i64: 1, 1, 32>}, {transform_indices = @transform_12, window_bounds = array<i64: 1, 1, 32>}, {transform_indices = @transform_13, window_bounds = array<i64: 1, 1, 32>}, {transform_indices = @transform_14, window_bounds = array<i64: 1, 1, 32>}, {transform_indices = @transform_15, window_bounds = array<i64: 1, 1, 32>}, {pipeline_mode = #tpu.pipeline_mode<synchronous>, transform_indices = @transform_16, window_bounds = array<i64: 1, 32>}, {pipeline_mode = #tpu.pipeline_mode<synchronous>, transform_indices = @transform_17, window_bounds = array<i64: 1, 32>}, {pipeline_mode = #tpu.pipeline_mode<synchronous>, transform_indices = @transform_18, window_bounds = array<i64: 32, 8>}, {pipeline_mode = #tpu.pipeline_mode<synchronous>, transform_indices = @transform_19, window_bounds = array<i64: 1, 8>}, {transform_indices = @transform_20, window_bounds = array<i64: 1, 16, 8>}, {transform_indices = @transform_21, window_bounds = array<i64: 1, 1, 4, 16, 16>}]} {
    %c0_i32 = arith.constant 0 : i32
    %0 = arith.cmpi eq, %arg1, %c0_i32 : i32
    %1 = arith.extui %0 : i1 to i32
    %c0_i32_0 = arith.constant 0 : i32
    %2 = arith.cmpi ne, %1, %c0_i32_0 : i32
    scf.if %2 {
      %c0_69 = arith.constant 0 : index
      %c0_70 = arith.constant 0 : index
      %c0_71 = arith.constant 0 : index
      %151 = vector.load %arg2[%c0_69, %c0_70, %c0_71] : memref<1x16x8xf32, #tpu.memory_space<vmem>>, vector<1x16x8xf32>
      %152 = vector.shape_cast %151 : vector<1x16x8xf32> to vector<16x8xf32>
      %cst_72 = arith.constant dense<0.000000e+00> : vector<8xf32>
      %153 = vector.multi_reduction <add>, %152, %cst_72 [0] : vector<16x8xf32> to vector<8xf32>
      %154 = vector.shape_cast %153 : vector<8xf32> to vector<1x8xf32>
      %cst_73 = arith.constant 1.600000e+01 : f32
      %155 = vector.broadcast %cst_73 : f32 to vector<1x8xf32>
      %156 = arith.divf %154, %155 : vector<1x8xf32>
      %157 = vector.broadcast %156 : vector<1x8xf32> to vector<16x8xf32>
      %158 = arith.subf %152, %157 : vector<16x8xf32>
      %159 = arith.mulf %158, %158 : vector<16x8xf32>
      %cst_74 = arith.constant dense<0.000000e+00> : vector<8xf32>
      %160 = vector.multi_reduction <add>, %159, %cst_74 [0] : vector<16x8xf32> to vector<8xf32>
      %161 = vector.shape_cast %160 : vector<8xf32> to vector<1x8xf32>
      %cst_75 = arith.constant 1.600000e+01 : f32
      %162 = vector.broadcast %cst_75 : f32 to vector<1x8xf32>
      %163 = arith.divf %161, %162 : vector<1x8xf32>
      %cst_76 = arith.constant 9.99999974E-6 : f32
      %164 = vector.broadcast %cst_76 : f32 to vector<1x8xf32>
      %165 = arith.addf %163, %164 : vector<1x8xf32>
      %166 = math.sqrt %165 : vector<1x8xf32>
      %c0_77 = arith.constant 0 : index
      %c0_78 = arith.constant 0 : index
      %167 = vector.load %arg25[%c0_77, %c0_78] : memref<1x8xf32, #tpu.memory_space<vmem>>, vector<1x8xf32>
      tpu.vector_store %arg25[%c0_77, %c0_78], %156 {strides = array<i32>} : memref<1x8xf32, #tpu.memory_space<vmem>>, vector<1x8xf32>,
      %c0_79 = arith.constant 0 : index
      %c0_80 = arith.constant 0 : index
      %168 = vector.load %arg26[%c0_79, %c0_80] : memref<1x8xf32, #tpu.memory_space<vmem>>, vector<1x8xf32>
      tpu.vector_store %arg26[%c0_79, %c0_80], %166 {strides = array<i32>} : memref<1x8xf32, #tpu.memory_space<vmem>>, vector<1x8xf32>,
      %169 = vector.broadcast %156 : vector<1x8xf32> to vector<16x8xf32>
      %170 = arith.subf %152, %169 : vector<16x8xf32>
      %171 = vector.broadcast %166 : vector<1x8xf32> to vector<16x8xf32>
      %172 = arith.divf %170, %171 : vector<16x8xf32>
      %173 = arith.truncf %172 : vector<16x8xf32> to vector<16x8xbf16>
      %c0_81 = arith.constant 0 : index
      %c0_82 = arith.constant 0 : index
      %174 = vector.load %arg3[%c0_81, %c0_82] : memref<8x32xbf16, #tpu.memory_space<vmem>>, vector<8x32xbf16>
      %cst_83 = arith.constant dense<0.000000e+00> : vector<16x32xf32>
      %175 = tpu.matmul %173, %174, %cst_83 {dimension_numbers = #tpu.dot_dimension_numbers<[1], [0], [0], [1], [0, 0, 1, 1], [], []>} : vector<16x8xbf16>, vector<8x32xbf16>, vector<16x32xf32> -> vector<16x32xf32>
      %c0_84 = arith.constant 0 : index
      %c0_85 = arith.constant 0 : index
      %176 = vector.load %arg4[%c0_84, %c0_85] : memref<1x32xf32, #tpu.memory_space<vmem>>, vector<1x32xf32>
      %177 = vector.broadcast %176 : vector<1x32xf32> to vector<16x32xf32>
      %178 = arith.addf %175, %177 : vector<16x32xf32>
      %c0_86 = arith.constant 0 : index
      %c0_87 = arith.constant 0 : index
      %179 = vector.load %arg5[%c0_86, %c0_87] : memref<16x32xf32, #tpu.memory_space<vmem>>, vector<16x32xf32>
      %180 = arith.addf %178, %179 : vector<16x32xf32>
      %c0_88 = arith.constant 0 : index
      %c0_89 = arith.constant 0 : index
      %181 = vector.load %arg24[%c0_88, %c0_89] : memref<16x32xf32, #tpu.memory_space<vmem>>, vector<16x32xf32>
      tpu.vector_store %arg24[%c0_88, %c0_89], %180 {strides = array<i32>} : memref<16x32xf32, #tpu.memory_space<vmem>>, vector<16x32xf32>,
    } else {
    }
    %c0 = arith.constant 0 : index
    %c0_1 = arith.constant 0 : index
    %3 = vector.load %arg24[%c0, %c0_1] : memref<16x32xf32, #tpu.memory_space<vmem>>, vector<16x32xf32>
    %4 = arith.truncf %3 : vector<16x32xf32> to vector<16x32xbf16>
    %c0_2 = arith.constant 0 : index
    %c0_3 = arith.constant 0 : index
    %c0_4 = arith.constant 0 : index
    %5 = vector.load %arg6[%c0_2, %c0_3, %c0_4] : memref<1x32x96xbf16, #tpu.memory_space<vmem>>, vector<1x32x96xbf16>
    %6 = vector.shape_cast %5 : vector<1x32x96xbf16> to vector<32x96xbf16>
    %cst = arith.constant dense<0.000000e+00> : vector<16x96xf32>
    %7 = tpu.matmul %4, %6, %cst {dimension_numbers = #tpu.dot_dimension_numbers<[1], [0], [0], [1], [0, 0, 1, 1], [], []>} : vector<16x32xbf16>, vector<32x96xbf16>, vector<16x96xf32> -> vector<16x96xf32>
    %c0_5 = arith.constant 0 : index
    %c0_6 = arith.constant 0 : index
    %c0_7 = arith.constant 0 : index
    %8 = vector.load %arg7[%c0_5, %c0_6, %c0_7] : memref<1x1x96xf32, #tpu.memory_space<vmem>>, vector<1x1x96xf32>
    %9 = vector.shape_cast %8 : vector<1x1x96xf32> to vector<1x96xf32>
    %10 = vector.broadcast %9 : vector<1x96xf32> to vector<16x96xf32>
    %11 = arith.addf %7, %10 : vector<16x96xf32>
    %12 = vector.extract_strided_slice %11 {offsets = [0, 0], sizes = [16, 8], strides = [1, 1]} : vector<16x96xf32> to vector<16x8xf32>
    %13 = vector.extract_strided_slice %11 {offsets = [0, 8], sizes = [16, 8], strides = [1, 1]} : vector<16x96xf32> to vector<16x8xf32>
    %14 = vector.extract_strided_slice %11 {offsets = [0, 16], sizes = [16, 8], strides = [1, 1]} : vector<16x96xf32> to vector<16x8xf32>
    %15 = vector.extract_strided_slice %11 {offsets = [0, 24], sizes = [16, 8], strides = [1, 1]} : vector<16x96xf32> to vector<16x8xf32>
    %16 = vector.shape_cast %12 : vector<16x8xf32> to vector<1x16x8xf32>
    %17 = vector.shape_cast %13 : vector<16x8xf32> to vector<1x16x8xf32>
    %18 = vector.shape_cast %14 : vector<16x8xf32> to vector<1x16x8xf32>
    %19 = vector.shape_cast %15 : vector<16x8xf32> to vector<1x16x8xf32>
    %20 = tpu.concatenate %16, %17, %18, %19 in 0 : vector<1x16x8xf32>, vector<1x16x8xf32>, vector<1x16x8xf32>, vector<1x16x8xf32> -> vector<4x16x8xf32>
    %21 = vector.extract_strided_slice %11 {offsets = [0, 32], sizes = [16, 8], strides = [1, 1]} : vector<16x96xf32> to vector<16x8xf32>
    %22 = vector.extract_strided_slice %11 {offsets = [0, 40], sizes = [16, 8], strides = [1, 1]} : vector<16x96xf32> to vector<16x8xf32>
    %23 = vector.extract_strided_slice %11 {offsets = [0, 48], sizes = [16, 8], strides = [1, 1]} : vector<16x96xf32> to vector<16x8xf32>
    %24 = vector.extract_strided_slice %11 {offsets = [0, 56], sizes = [16, 8], strides = [1, 1]} : vector<16x96xf32> to vector<16x8xf32>
    %25 = vector.shape_cast %21 : vector<16x8xf32> to vector<1x16x8xf32>
    %26 = vector.shape_cast %22 : vector<16x8xf32> to vector<1x16x8xf32>
    %27 = vector.shape_cast %23 : vector<16x8xf32> to vector<1x16x8xf32>
    %28 = vector.shape_cast %24 : vector<16x8xf32> to vector<1x16x8xf32>
    %29 = tpu.concatenate %25, %26, %27, %28 in 0 : vector<1x16x8xf32>, vector<1x16x8xf32>, vector<1x16x8xf32>, vector<1x16x8xf32> -> vector<4x16x8xf32>
    %30 = vector.extract_strided_slice %11 {offsets = [0, 64], sizes = [16, 8], strides = [1, 1]} : vector<16x96xf32> to vector<16x8xf32>
    %31 = vector.extract_strided_slice %11 {offsets = [0, 72], sizes = [16, 8], strides = [1, 1]} : vector<16x96xf32> to vector<16x8xf32>
    %32 = vector.extract_strided_slice %11 {offsets = [0, 80], sizes = [16, 8], strides = [1, 1]} : vector<16x96xf32> to vector<16x8xf32>
    %33 = vector.extract_strided_slice %11 {offsets = [0, 88], sizes = [16, 8], strides = [1, 1]} : vector<16x96xf32> to vector<16x8xf32>
    %34 = vector.shape_cast %30 : vector<16x8xf32> to vector<1x16x8xf32>
    %35 = vector.shape_cast %31 : vector<16x8xf32> to vector<1x16x8xf32>
    %36 = vector.shape_cast %32 : vector<16x8xf32> to vector<1x16x8xf32>
    %37 = vector.shape_cast %33 : vector<16x8xf32> to vector<1x16x8xf32>
    %38 = tpu.concatenate %34, %35, %36, %37 in 0 : vector<1x16x8xf32>, vector<1x16x8xf32>, vector<1x16x8xf32>, vector<1x16x8xf32> -> vector<4x16x8xf32>
    %cst_8 = arith.constant 0.353553385 : f32
    %39 = vector.broadcast %cst_8 : f32 to vector<4x16x8xf32>
    %40 = arith.mulf %20, %39 : vector<4x16x8xf32>
    %41 = arith.truncf %40 : vector<4x16x8xf32> to vector<4x16x8xbf16>
    %42 = arith.truncf %29 : vector<4x16x8xf32> to vector<4x16x8xbf16>
    %43 = arith.truncf %38 : vector<4x16x8xf32> to vector<4x16x8xbf16>
    %cst_9 = arith.constant dense<0.000000e+00> : vector<4x16x16xf32>
    %44 = tpu.matmul %41, %42, %cst_9 {dimension_numbers = #tpu.dot_dimension_numbers<[2], [2], [1], [1], [0, 0, 0, 1, 1, 1], [0], [0]>} : vector<4x16x8xbf16>, vector<4x16x8xbf16>, vector<4x16x16xf32> -> vector<4x16x16xf32>
    %cst_10 = arith.constant dense<0xFF800000> : vector<4x16xf32>
    %45 = vector.multi_reduction <maximumf>, %44, %cst_10 [2] : vector<4x16x16xf32> to vector<4x16xf32>
    %46 = vector.shape_cast %45 : vector<4x16xf32> to vector<4x16x1xf32>
    %47 = vector.broadcast %46 : vector<4x16x1xf32> to vector<4x16x16xf32>
    %48 = arith.subf %44, %47 : vector<4x16x16xf32>
    %49 = math.exp %48 : vector<4x16x16xf32>
    %cst_11 = arith.constant dense<0.000000e+00> : vector<4x16xf32>
    %50 = vector.multi_reduction <add>, %49, %cst_11 [2] : vector<4x16x16xf32> to vector<4x16xf32>
    %51 = vector.shape_cast %50 : vector<4x16xf32> to vector<4x16x1xf32>
    %52 = tpu.reciprocal %51 {approx = true} : vector<4x16x1xf32> -> vector<4x16x1xf32>
    %53 = vector.broadcast %52 : vector<4x16x1xf32> to vector<4x16x16xf32>
    %54 = arith.mulf %49, %53 : vector<4x16x16xf32>
    %c0_12 = arith.constant 0 : index
    %c0_13 = arith.constant 0 : index
    %c0_14 = arith.constant 0 : index
    %c0_15 = arith.constant 0 : index
    %c0_16 = arith.constant 0 : index
    %55 = vector.load %arg23[%c0_12, %c0_13, %c0_14, %c0_15, %c0_16] : memref<1x1x4x16x16xf32, #tpu.memory_space<vmem>>, vector<1x1x4x16x16xf32>
    %56 = vector.shape_cast %55 : vector<1x1x4x16x16xf32> to vector<4x16x16xf32>
    %57 = vector.shape_cast %54 : vector<4x16x16xf32> to vector<1x1x4x16x16xf32>
    tpu.vector_store %arg23[%c0_12, %c0_13, %c0_14, %c0_15, %c0_16], %57 {strides = array<i32>} : memref<1x1x4x16x16xf32, #tpu.memory_space<vmem>>, vector<1x1x4x16x16xf32>,
    %58 = arith.truncf %54 : vector<4x16x16xf32> to vector<4x16x16xbf16>
    %cst_17 = arith.constant dense<0.000000e+00> : vector<4x16x8xf32>
    %59 = tpu.matmul %58, %43, %cst_17 {dimension_numbers = #tpu.dot_dimension_numbers<[2], [1], [1], [2], [0, 0, 0, 1, 1, 2], [0], [0]>} : vector<4x16x16xbf16>, vector<4x16x8xbf16>, vector<4x16x8xf32> -> vector<4x16x8xf32>
    %60 = arith.truncf %59 : vector<4x16x8xf32> to vector<4x16x8xbf16>
    %c0_18 = arith.constant 0 : index
    %c0_19 = arith.constant 0 : index
    %c0_20 = arith.constant 0 : index
    %c0_21 = arith.constant 0 : index
    %61 = vector.load %arg8[%c0_18, %c0_19, %c0_20, %c0_21] : memref<1x4x8x32xbf16, #tpu.memory_space<vmem>>, vector<1x4x8x32xbf16>
    %62 = vector.shape_cast %61 : vector<1x4x8x32xbf16> to vector<4x8x32xbf16>
    %cst_22 = arith.constant dense<0.000000e+00> : vector<4x16x32xf32>
    %63 = tpu.matmul %60, %62, %cst_22 {dimension_numbers = #tpu.dot_dimension_numbers<[2], [1], [1], [2], [0, 0, 0, 1, 1, 2], [0], [0]>} : vector<4x16x8xbf16>, vector<4x8x32xbf16>, vector<4x16x32xf32> -> vector<4x16x32xf32>
    %cst_23 = arith.constant dense<0.000000e+00> : vector<16x32xf32>
    %64 = vector.multi_reduction <add>, %63, %cst_23 [0] : vector<4x16x32xf32> to vector<16x32xf32>
    %c0_24 = arith.constant 0 : index
    %c0_25 = arith.constant 0 : index
    %c0_26 = arith.constant 0 : index
    %65 = vector.load %arg9[%c0_24, %c0_25, %c0_26] : memref<1x1x32xf32, #tpu.memory_space<vmem>>, vector<1x1x32xf32>
    %66 = vector.shape_cast %65 : vector<1x1x32xf32> to vector<1x32xf32>
    %67 = vector.broadcast %66 : vector<1x32xf32> to vector<16x32xf32>
    %68 = arith.addf %64, %67 : vector<16x32xf32>
    %69 = arith.addf %3, %68 : vector<16x32xf32>
    %c0_27 = arith.constant 0 : index
    %c0_28 = arith.constant 0 : index
    %c0_29 = arith.constant 0 : index
    %70 = vector.load %arg14[%c0_27, %c0_28, %c0_29] : memref<1x1x32xf32, #tpu.memory_space<vmem>>, vector<1x1x32xf32>
    %71 = vector.shape_cast %70 : vector<1x1x32xf32> to vector<1x32xf32>
    %c0_30 = arith.constant 0 : index
    %c0_31 = arith.constant 0 : index
    %c0_32 = arith.constant 0 : index
    %72 = vector.load %arg15[%c0_30, %c0_31, %c0_32] : memref<1x1x32xf32, #tpu.memory_space<vmem>>, vector<1x1x32xf32>
    %73 = vector.shape_cast %72 : vector<1x1x32xf32> to vector<1x32xf32>
    %cst_33 = arith.constant dense<0.000000e+00> : vector<16xf32>
    %74 = vector.multi_reduction <add>, %69, %cst_33 [1] : vector<16x32xf32> to vector<16xf32>
    %75 = vector.shape_cast %74 : vector<16xf32> to vector<16x1xf32>
    %cst_34 = arith.constant 3.200000e+01 : f32
    %76 = vector.broadcast %cst_34 : f32 to vector<16x1xf32>
    %77 = arith.divf %75, %76 : vector<16x1xf32>
    %78 = vector.broadcast %77 : vector<16x1xf32> to vector<16x32xf32>
    %79 = arith.subf %69, %78 : vector<16x32xf32>
    %80 = arith.mulf %79, %79 : vector<16x32xf32>
    %cst_35 = arith.constant dense<0.000000e+00> : vector<16xf32>
    %81 = vector.multi_reduction <add>, %80, %cst_35 [1] : vector<16x32xf32> to vector<16xf32>
    %82 = vector.shape_cast %81 : vector<16xf32> to vector<16x1xf32>
    %cst_36 = arith.constant 3.200000e+01 : f32
    %83 = vector.broadcast %cst_36 : f32 to vector<16x1xf32>
    %84 = arith.divf %82, %83 : vector<16x1xf32>
    %85 = vector.broadcast %77 : vector<16x1xf32> to vector<16x32xf32>
    %86 = arith.subf %69, %85 : vector<16x32xf32>
    %cst_37 = arith.constant 9.99999974E-6 : f32
    %87 = vector.broadcast %cst_37 : f32 to vector<16x1xf32>
    %88 = arith.addf %84, %87 : vector<16x1xf32>
    %89 = math.rsqrt %88 : vector<16x1xf32>
    %90 = vector.broadcast %89 : vector<16x1xf32> to vector<16x32xf32>
    %91 = arith.mulf %86, %90 : vector<16x32xf32>
    %92 = vector.broadcast %71 : vector<1x32xf32> to vector<16x32xf32>
    %93 = arith.mulf %91, %92 : vector<16x32xf32>
    %94 = vector.broadcast %73 : vector<1x32xf32> to vector<16x32xf32>
    %95 = arith.addf %93, %94 : vector<16x32xf32>
    %96 = arith.truncf %95 : vector<16x32xf32> to vector<16x32xbf16>
    %c0_38 = arith.constant 0 : index
    %c0_39 = arith.constant 0 : index
    %c0_40 = arith.constant 0 : index
    %97 = vector.load %arg10[%c0_38, %c0_39, %c0_40] : memref<1x32x64xbf16, #tpu.memory_space<vmem>>, vector<1x32x64xbf16>
    %98 = vector.shape_cast %97 : vector<1x32x64xbf16> to vector<32x64xbf16>
    %cst_41 = arith.constant dense<0.000000e+00> : vector<16x64xf32>
    %99 = tpu.matmul %96, %98, %cst_41 {dimension_numbers = #tpu.dot_dimension_numbers<[1], [0], [0], [1], [0, 0, 1, 1], [], []>} : vector<16x32xbf16>, vector<32x64xbf16>, vector<16x64xf32> -> vector<16x64xf32>
    %c0_42 = arith.constant 0 : index
    %c0_43 = arith.constant 0 : index
    %c0_44 = arith.constant 0 : index
    %100 = vector.load %arg11[%c0_42, %c0_43, %c0_44] : memref<1x1x64xf32, #tpu.memory_space<vmem>>, vector<1x1x64xf32>
    %101 = vector.shape_cast %100 : vector<1x1x64xf32> to vector<1x64xf32>
    %102 = vector.broadcast %101 : vector<1x64xf32> to vector<16x64xf32>
    %103 = arith.addf %99, %102 : vector<16x64xf32>
    %cst_45 = arith.constant 5.000000e-01 : f32
    %104 = vector.broadcast %cst_45 : f32 to vector<16x64xf32>
    %105 = arith.mulf %104, %103 : vector<16x64xf32>
    %cst_46 = arith.constant 0.707106769 : f32
    %106 = vector.broadcast %cst_46 : f32 to vector<16x64xf32>
    %107 = arith.mulf %103, %106 : vector<16x64xf32>
    %108 = math.erf %107 : vector<16x64xf32>
    %cst_47 = arith.constant 1.000000e+00 : f32
    %109 = vector.broadcast %cst_47 : f32 to vector<16x64xf32>
    %110 = arith.addf %109, %108 : vector<16x64xf32>
    %111 = arith.mulf %105, %110 : vector<16x64xf32>
    %112 = arith.truncf %111 : vector<16x64xf32> to vector<16x64xbf16>
    %c0_48 = arith.constant 0 : index
    %c0_49 = arith.constant 0 : index
    %c0_50 = arith.constant 0 : index
    %113 = vector.load %arg12[%c0_48, %c0_49, %c0_50] : memref<1x64x32xbf16, #tpu.memory_space<vmem>>, vector<1x64x32xbf16>
    %114 = vector.shape_cast %113 : vector<1x64x32xbf16> to vector<64x32xbf16>
    %cst_51 = arith.constant dense<0.000000e+00> : vector<16x32xf32>
    %115 = tpu.matmul %112, %114, %cst_51 {dimension_numbers = #tpu.dot_dimension_numbers<[1], [0], [0], [1], [0, 0, 1, 1], [], []>} : vector<16x64xbf16>, vector<64x32xbf16>, vector<16x32xf32> -> vector<16x32xf32>
    %c0_52 = arith.constant 0 : index
    %c0_53 = arith.constant 0 : index
    %c0_54 = arith.constant 0 : index
    %116 = vector.load %arg13[%c0_52, %c0_53, %c0_54] : memref<1x1x32xf32, #tpu.memory_space<vmem>>, vector<1x1x32xf32>
    %117 = vector.shape_cast %116 : vector<1x1x32xf32> to vector<1x32xf32>
    %118 = vector.broadcast %117 : vector<1x32xf32> to vector<16x32xf32>
    %119 = arith.addf %115, %118 : vector<16x32xf32>
    %120 = arith.addf %95, %119 : vector<16x32xf32>
    %c0_55 = arith.constant 0 : index
    %c0_56 = arith.constant 0 : index
    %c0_57 = arith.constant 0 : index
    %121 = vector.load %arg16[%c0_55, %c0_56, %c0_57] : memref<1x1x32xf32, #tpu.memory_space<vmem>>, vector<1x1x32xf32>
    %122 = vector.shape_cast %121 : vector<1x1x32xf32> to vector<1x32xf32>
    %c0_58 = arith.constant 0 : index
    %c0_59 = arith.constant 0 : index
    %c0_60 = arith.constant 0 : index
    %123 = vector.load %arg17[%c0_58, %c0_59, %c0_60] : memref<1x1x32xf32, #tpu.memory_space<vmem>>, vector<1x1x32xf32>
    %124 = vector.shape_cast %123 : vector<1x1x32xf32> to vector<1x32xf32>
    %cst_61 = arith.constant dense<0.000000e+00> : vector<16xf32>
    %125 = vector.multi_reduction <add>, %120, %cst_61 [1] : vector<16x32xf32> to vector<16xf32>
    %126 = vector.shape_cast %125 : vector<16xf32> to vector<16x1xf32>
    %cst_62 = arith.constant 3.200000e+01 : f32
    %127 = vector.broadcast %cst_62 : f32 to vector<16x1xf32>
    %128 = arith.divf %126, %127 : vector<16x1xf32>
    %129 = vector.broadcast %128 : vector<16x1xf32> to vector<16x32xf32>
    %130 = arith.subf %120, %129 : vector<16x32xf32>
    %131 = arith.mulf %130, %130 : vector<16x32xf32>
    %cst_63 = arith.constant dense<0.000000e+00> : vector<16xf32>
    %132 = vector.multi_reduction <add>, %131, %cst_63 [1] : vector<16x32xf32> to vector<16xf32>
    %133 = vector.shape_cast %132 : vector<16xf32> to vector<16x1xf32>
    %cst_64 = arith.constant 3.200000e+01 : f32
    %134 = vector.broadcast %cst_64 : f32 to vector<16x1xf32>
    %135 = arith.divf %133, %134 : vector<16x1xf32>
    %136 = vector.broadcast %128 : vector<16x1xf32> to vector<16x32xf32>
    %137 = arith.subf %120, %136 : vector<16x32xf32>
    %cst_65 = arith.constant 9.99999974E-6 : f32
    %138 = vector.broadcast %cst_65 : f32 to vector<16x1xf32>
    %139 = arith.addf %135, %138 : vector<16x1xf32>
    %140 = math.rsqrt %139 : vector<16x1xf32>
    %141 = vector.broadcast %140 : vector<16x1xf32> to vector<16x32xf32>
    %142 = arith.mulf %137, %141 : vector<16x32xf32>
    %143 = vector.broadcast %122 : vector<1x32xf32> to vector<16x32xf32>
    %144 = arith.mulf %142, %143 : vector<16x32xf32>
    %145 = vector.broadcast %124 : vector<1x32xf32> to vector<16x32xf32>
    %146 = arith.addf %144, %145 : vector<16x32xf32>
    %c0_66 = arith.constant 0 : index
    %c0_67 = arith.constant 0 : index
    %147 = vector.load %arg24[%c0_66, %c0_67] : memref<16x32xf32, #tpu.memory_space<vmem>>, vector<16x32xf32>
    tpu.vector_store %arg24[%c0_66, %c0_67], %146 {strides = array<i32>} : memref<16x32xf32, #tpu.memory_space<vmem>>, vector<16x32xf32>,
    %c1_i32 = arith.constant 1 : i32
    %148 = arith.cmpi eq, %arg1, %c1_i32 : i32
    %149 = arith.extui %148 : i1 to i32
    %c0_i32_68 = arith.constant 0 : i32
    %150 = arith.cmpi ne, %149, %c0_i32_68 : i32
    scf.if %150 {
      %c0_69 = arith.constant 0 : index
      %c0_70 = arith.constant 0 : index
      %151 = vector.load %arg24[%c0_69, %c0_70] : memref<16x32xf32, #tpu.memory_space<vmem>>, vector<16x32xf32>
      %c0_71 = arith.constant 0 : index
      %c0_72 = arith.constant 0 : index
      %152 = vector.load %arg18[%c0_71, %c0_72] : memref<1x32xf32, #tpu.memory_space<vmem>>, vector<1x32xf32>
      %c0_73 = arith.constant 0 : index
      %c0_74 = arith.constant 0 : index
      %153 = vector.load %arg19[%c0_73, %c0_74] : memref<1x32xf32, #tpu.memory_space<vmem>>, vector<1x32xf32>
      %cst_75 = arith.constant dense<0.000000e+00> : vector<16xf32>
      %154 = vector.multi_reduction <add>, %151, %cst_75 [1] : vector<16x32xf32> to vector<16xf32>
      %155 = vector.shape_cast %154 : vector<16xf32> to vector<16x1xf32>
      %cst_76 = arith.constant 3.200000e+01 : f32
      %156 = vector.broadcast %cst_76 : f32 to vector<16x1xf32>
      %157 = arith.divf %155, %156 : vector<16x1xf32>
      %158 = vector.broadcast %157 : vector<16x1xf32> to vector<16x32xf32>
      %159 = arith.subf %151, %158 : vector<16x32xf32>
      %160 = arith.mulf %159, %159 : vector<16x32xf32>
      %cst_77 = arith.constant dense<0.000000e+00> : vector<16xf32>
      %161 = vector.multi_reduction <add>, %160, %cst_77 [1] : vector<16x32xf32> to vector<16xf32>
      %162 = vector.shape_cast %161 : vector<16xf32> to vector<16x1xf32>
      %cst_78 = arith.constant 3.200000e+01 : f32
      %163 = vector.broadcast %cst_78 : f32 to vector<16x1xf32>
      %164 = arith.divf %162, %163 : vector<16x1xf32>
      %165 = vector.broadcast %157 : vector<16x1xf32> to vector<16x32xf32>
      %166 = arith.subf %151, %165 : vector<16x32xf32>
      %cst_79 = arith.constant 9.99999974E-6 : f32
      %167 = vector.broadcast %cst_79 : f32 to vector<16x1xf32>
      %168 = arith.addf %164, %167 : vector<16x1xf32>
      %169 = math.rsqrt %168 : vector<16x1xf32>
      %170 = vector.broadcast %169 : vector<16x1xf32> to vector<16x32xf32>
      %171 = arith.mulf %166, %170 : vector<16x32xf32>
      %172 = vector.broadcast %152 : vector<1x32xf32> to vector<16x32xf32>
      %173 = arith.mulf %171, %172 : vector<16x32xf32>
      %174 = vector.broadcast %153 : vector<1x32xf32> to vector<16x32xf32>
      %175 = arith.addf %173, %174 : vector<16x32xf32>
      %176 = arith.truncf %175 : vector<16x32xf32> to vector<16x32xbf16>
      %c0_80 = arith.constant 0 : index
      %c0_81 = arith.constant 0 : index
      %177 = vector.load %arg20[%c0_80, %c0_81] : memref<32x8xbf16, #tpu.memory_space<vmem>>, vector<32x8xbf16>
      %cst_82 = arith.constant dense<0.000000e+00> : vector<16x8xf32>
      %178 = tpu.matmul %176, %177, %cst_82 {dimension_numbers = #tpu.dot_dimension_numbers<[1], [0], [0], [1], [0, 0, 1, 1], [], []>} : vector<16x32xbf16>, vector<32x8xbf16>, vector<16x8xf32> -> vector<16x8xf32>
      %c0_83 = arith.constant 0 : index
      %c0_84 = arith.constant 0 : index
      %179 = vector.load %arg21[%c0_83, %c0_84] : memref<1x8xf32, #tpu.memory_space<vmem>>, vector<1x8xf32>
      %180 = vector.broadcast %179 : vector<1x8xf32> to vector<16x8xf32>
      %181 = arith.addf %178, %180 : vector<16x8xf32>
      %c0_85 = arith.constant 0 : index
      %c0_86 = arith.constant 0 : index
      %182 = vector.load %arg26[%c0_85, %c0_86] : memref<1x8xf32, #tpu.memory_space<vmem>>, vector<1x8xf32>
      %183 = vector.broadcast %182 : vector<1x8xf32> to vector<16x8xf32>
      %184 = arith.mulf %181, %183 : vector<16x8xf32>
      %c0_87 = arith.constant 0 : index
      %c0_88 = arith.constant 0 : index
      %185 = vector.load %arg25[%c0_87, %c0_88] : memref<1x8xf32, #tpu.memory_space<vmem>>, vector<1x8xf32>
      %186 = vector.broadcast %185 : vector<1x8xf32> to vector<16x8xf32>
      %187 = arith.addf %184, %186 : vector<16x8xf32>
      %c0_89 = arith.constant 0 : index
      %c0_90 = arith.constant 0 : index
      %c0_91 = arith.constant 0 : index
      %188 = vector.load %arg22[%c0_89, %c0_90, %c0_91] : memref<1x16x8xf32, #tpu.memory_space<vmem>>, vector<1x16x8xf32>
      %189 = vector.shape_cast %188 : vector<1x16x8xf32> to vector<16x8xf32>
      %190 = vector.shape_cast %187 : vector<16x8xf32> to vector<1x16x8xf32>
      tpu.vector_store %arg22[%c0_89, %c0_90, %c0_91], %190 {strides = array<i32>} : memref<1x16x8xf32, #tpu.memory_space<vmem>>, vector<1x16x8xf32>,
    } else {
    }
    return
  }
  func.func @transform_0(%arg0: i32, %arg1: i32) -> (i32, i32, i32) {
    %c0_i32 = arith.constant 0 : i32
    %c0_i32_0 = arith.constant 0 : i32
    %c0_i32_1 = arith.constant 0 : i32
    return %arg0, %c0_i32, %c0_i32_0 : i32, i32, i32
  }
  func.func @transform_1(%arg0: i32, %arg1: i32) -> (i32, i32) {
    %c0_i32 = arith.constant 0 : i32
    %c0_i32_0 = arith.constant 0 : i32
    %c0_i32_1 = arith.constant 0 : i32
    return %c0_i32, %c0_i32_0 : i32, i32
  }
  func.func @transform_2(%arg0: i32, %arg1: i32) -> (i32, i32) {
    %c0_i32 = arith.constant 0 : i32
    %c0_i32_0 = arith.constant 0 : i32
    %c0_i32_1 = arith.constant 0 : i32
    return %c0_i32, %c0_i32_0 : i32, i32
  }
  func.func @transform_3(%arg0: i32, %arg1: i32) -> (i32, i32) {
    %c0_i32 = arith.constant 0 : i32
    %c0_i32_0 = arith.constant 0 : i32
    %c0_i32_1 = arith.constant 0 : i32
    return %c0_i32, %c0_i32_0 : i32, i32
  }
  func.func @transform_4(%arg0: i32, %arg1: i32) -> (i32, i32, i32) {
    %c0_i32 = arith.constant 0 : i32
    %c0_i32_0 = arith.constant 0 : i32
    %c0_i32_1 = arith.constant 0 : i32
    return %arg1, %c0_i32, %c0_i32_0 : i32, i32, i32
  }
  func.func @transform_5(%arg0: i32, %arg1: i32) -> (i32, i32, i32) {
    %c0_i32 = arith.constant 0 : i32
    %c0_i32_0 = arith.constant 0 : i32
    %c0_i32_1 = arith.constant 0 : i32
    return %arg1, %c0_i32, %c0_i32_0 : i32, i32, i32
  }
  func.func @transform_6(%arg0: i32, %arg1: i32) -> (i32, i32, i32, i32) {
    %c0_i32 = arith.constant 0 : i32
    %c0_i32_0 = arith.constant 0 : i32
    %c0_i32_1 = arith.constant 0 : i32
    %c0_i32_2 = arith.constant 0 : i32
    return %arg1, %c0_i32, %c0_i32_0, %c0_i32_1 : i32, i32, i32, i32
  }
  func.func @transform_7(%arg0: i32, %arg1: i32) -> (i32, i32, i32) {
    %c0_i32 = arith.constant 0 : i32
    %c0_i32_0 = arith.constant 0 : i32
    %c0_i32_1 = arith.constant 0 : i32
    return %arg1, %c0_i32, %c0_i32_0 : i32, i32, i32
  }
  func.func @transform_8(%arg0: i32, %arg1: i32) -> (i32, i32, i32) {
    %c0_i32 = arith.constant 0 : i32
    %c0_i32_0 = arith.constant 0 : i32
    %c0_i32_1 = arith.constant 0 : i32
    return %arg1, %c0_i32, %c0_i32_0 : i32, i32, i32
  }
  func.func @transform_9(%arg0: i32, %arg1: i32) -> (i32, i32, i32) {
    %c0_i32 = arith.constant 0 : i32
    %c0_i32_0 = arith.constant 0 : i32
    %c0_i32_1 = arith.constant 0 : i32
    return %arg1, %c0_i32, %c0_i32_0 : i32, i32, i32
  }
  func.func @transform_10(%arg0: i32, %arg1: i32) -> (i32, i32, i32) {
    %c0_i32 = arith.constant 0 : i32
    %c0_i32_0 = arith.constant 0 : i32
    %c0_i32_1 = arith.constant 0 : i32
    return %arg1, %c0_i32, %c0_i32_0 : i32, i32, i32
  }
  func.func @transform_11(%arg0: i32, %arg1: i32) -> (i32, i32, i32) {
    %c0_i32 = arith.constant 0 : i32
    %c0_i32_0 = arith.constant 0 : i32
    %c0_i32_1 = arith.constant 0 : i32
    return %arg1, %c0_i32, %c0_i32_0 : i32, i32, i32
  }
  func.func @transform_12(%arg0: i32, %arg1: i32) -> (i32, i32, i32) {
    %c0_i32 = arith.constant 0 : i32
    %c0_i32_0 = arith.constant 0 : i32
    %c0_i32_1 = arith.constant 0 : i32
    return %arg1, %c0_i32, %c0_i32_0 : i32, i32, i32
  }
  func.func @transform_13(%arg0: i32, %arg1: i32) -> (i32, i32, i32) {
    %c0_i32 = arith.constant 0 : i32
    %c0_i32_0 = arith.constant 0 : i32
    %c0_i32_1 = arith.constant 0 : i32
    return %arg1, %c0_i32, %c0_i32_0 : i32, i32, i32
  }
  func.func @transform_14(%arg0: i32, %arg1: i32) -> (i32, i32, i32) {
    %c0_i32 = arith.constant 0 : i32
    %c0_i32_0 = arith.constant 0 : i32
    %c0_i32_1 = arith.constant 0 : i32
    return %arg1, %c0_i32, %c0_i32_0 : i32, i32, i32
  }
  func.func @transform_15(%arg0: i32, %arg1: i32) -> (i32, i32, i32) {
    %c0_i32 = arith.constant 0 : i32
    %c0_i32_0 = arith.constant 0 : i32
    %c0_i32_1 = arith.constant 0 : i32
    return %arg1, %c0_i32, %c0_i32_0 : i32, i32, i32
  }
  func.func @transform_16(%arg0: i32, %arg1: i32) -> (i32, i32) {
    %c0_i32 = arith.constant 0 : i32
    %c0_i32_0 = arith.constant 0 : i32
    %c0_i32_1 = arith.constant 0 : i32
    return %c0_i32, %c0_i32_0 : i32, i32
  }
  func.func @transform_17(%arg0: i32, %arg1: i32) -> (i32, i32) {
    %c0_i32 = arith.constant 0 : i32
    %c0_i32_0 = arith.constant 0 : i32
    %c0_i32_1 = arith.constant 0 : i32
    return %c0_i32, %c0_i32_0 : i32, i32
  }
  func.func @transform_18(%arg0: i32, %arg1: i32) -> (i32, i32) {
    %c0_i32 = arith.constant 0 : i32
    %c0_i32_0 = arith.constant 0 : i32
    %c0_i32_1 = arith.constant 0 : i32
    return %c0_i32, %c0_i32_0 : i32, i32
  }
  func.func @transform_19(%arg0: i32, %arg1: i32) -> (i32, i32) {
    %c0_i32 = arith.constant 0 : i32
    %c0_i32_0 = arith.constant 0 : i32
    %c0_i32_1 = arith.constant 0 : i32
    return %c0_i32, %c0_i32_0 : i32, i32
  }
  func.func @transform_20(%arg0: i32, %arg1: i32) -> (i32, i32, i32) {
    %c0_i32 = arith.constant 0 : i32
    %c0_i32_0 = arith.constant 0 : i32
    %c0_i32_1 = arith.constant 0 : i32
    return %arg0, %c0_i32, %c0_i32_0 : i32, i32, i32
  }
  func.func @transform_21(%arg0: i32, %arg1: i32) -> (i32, i32, i32, i32, i32) {
    %c0_i32 = arith.constant 0 : i32
    %c0_i32_0 = arith.constant 0 : i32
    %c0_i32_1 = arith.constant 0 : i32
    %c0_i32_2 = arith.constant 0 : i32
    return %arg0, %arg1, %c0_i32, %c0_i32_0, %c0_i32_1 : i32, i32, i32, i32, i32
  }
}

</mosaic_0001>

<bundles_post_ra>
// kernel: encoder_forward.1
= control target key start
LH: loop header
LB: loop body
LE: loop exit
PB: predicated region body
PF: predicated region fallthrough
CT: control target
= control target key end

     0   :  { %s3438_s0 = inlined_call_operand.vmem [shape: f32[2,16,8], index: 0, kind: input, shape index: {}]   ;;  %s3439_s1 = inlined_call_operand.vmem [shape: bf16[8,32], index: 1, kind: input, shape index: {}]   ;;  %s3440_s2 = inlined_call_operand.hbm [shape: f32[1,32], index: 2, kind: input, shape index: {}]   ;;  %s3441_s3 = inlined_call_operand.vmem [shape: f32[16,32], index: 3, kind: input, shape index: {}]   ;;  %s3442_s4 = inlined_call_operand.vmem [shape: bf16[2,32,96], index: 4, kind: input, shape index: {}]   ;;  %s3443_s5 = inlined_call_operand.vmem [shape: f32[2,1,96], index: 5, kind: input, shape index: {}]   ;;  %s3444_s6 = inlined_call_operand.vmem [shape: bf16[2,4,8,32], index: 6, kind: input, shape index: {}]   ;;  %s3445_s7 = inlined_call_operand.vmem [shape: f32[2,1,32], index: 7, kind: input, shape index: {}]   ;;  %s3446_s8 = inlined_call_operand.vmem [shape: bf16[2,32,64], index: 8, kind: input, shape index: {}]   ;;  %s3447_s9 = inlined_call_operand.vmem [shape: f32[2,1,64], index: 9, kind: input, shape index: {}]   ;;  %s3448_s10 = inlined_call_operand.vmem [shape: bf16[2,64,32], index: 10, kind: input, shape index: {}]   ;;  %s3449_s11 = inlined_call_operand.vmem [shape: f32[2,1,32], index: 11, kind: input, shape index: {}]   ;;  %s3450_s12 = inlined_call_operand.vmem [shape: f32[2,1,32], index: 12, kind: input, shape index: {}]   ;;  %s3451_s13 = inlined_call_operand.vmem [shape: f32[2,1,32], index: 13, kind: input, shape index: {}]   ;;  %s3452_s14 = inlined_call_operand.vmem [shape: f32[2,1,32], index: 14, kind: input, shape index: {}]   ;;  %s3453_s15 = inlined_call_operand.hbm [shape: f32[2,1,32], index: 15, kind: input, shape index: {}]   ;;  %s3454_s16 = inlined_call_operand.hbm [shape: f32[1,32], index: 16, kind: input, shape index: {}]   ;;  %s3455_s17 = inlined_call_operand.hbm [shape: f32[1,32], index: 17, kind: input, shape index: {}]   ;;  %s3456_s18 = inlined_call_operand.vmem [shape: bf16[32,8], index: 18, kind: input, shape index: {}]   ;;  %s3457_s19 = inlined_call_operand.hbm [shape: f32[1,8], index: 19, kind: input, shape index: {}]   ;;  %s3458_s20 = inlined_call_operand.vmem [shape: f32[2,16,8], index: 20, kind: output, shape index: {0}]   ;;  %s3459_s21 = inlined_call_operand.vmem [shape: f32[2,2,4,16,16], index: 21, kind: output, shape index: {1}]  }
   0x1   :  { %3469 = sst [smem:[#allocation26_spill]] %s3438_s0 }
   0x2   :  { %3470 = sst [smem:[#allocation27_spill]] %s3439_s1 }
   0x3   :  { %3471 = sst [smem:[#allocation28_spill]] %s3440_s2 }
   0x4   :  { %3472 = sst [smem:[#allocation29_spill]] %s3441_s3 }
   0x5   :  { %3473 = sst [smem:[#allocation30_spill]] %s3442_s4 }
   0x6   :  { %3474 = sst [smem:[#allocation31_spill]] %s3443_s5 }
   0x7   :  { %3475 = sst [smem:[#allocation32_spill]] %s3444_s6 }
   0x8   :  { %3476 = sst [smem:[#allocation33_spill]] %s3446_s8 }
   0x9   :  { %3477 = sst [smem:[#allocation34_spill]] %s3448_s10 }
   0xa   :  { %3478 = sst [smem:[#allocation35_spill]] %s3449_s11 }
   0xb   :  { %3479 = sst [smem:[#allocation36_spill]] %s3450_s12 }
   0xc   :  { %3480 = sst [smem:[#allocation37_spill]] %s3451_s13 }
   0xd   :  { %3481 = sst [smem:[#allocation38_spill]] %s3452_s14 }
   0xe   :  { %3482 = sst [smem:[#allocation39_spill]] %s3453_s15 }
   0xf   :  { %3483 = sst [smem:[#allocation40_spill]] %s3454_s16 }
  0x10   :  { %3484 = sst [smem:[#allocation41_spill]] %s3455_s17 }
  0x11   :  { %3485 = sst [smem:[#allocation42_spill]] %s3456_s18 }
  0x12   :  { %3486 = sst [smem:[#allocation43_spill]] %s3457_s19 }
  0x13   :  { %3487 = sst [smem:[#allocation44_spill]] %s3458_s20 }
  0x14   :  { %3488 = sst [smem:[#allocation45_spill]] %s3459_s21 }
  0x15   :  { %27 = vsyncpa [#allocation6], 0 }
  0x16   :  { %28 = vsyncpa [#allocation8], 0 }
  0x17   :  { %30 = vsyncpa [#allocation8 + $0x1], 0 }
  0x18   :  { %31 = vsyncpa [#allocation11], 0  ;;  %s2977_s2 = smov 0   ;;  %s2979_s25 = smov 0  }
  0x19   :  { %s2981_s26 = smov 0   ;;  %s2983_s27 = smov 0  }
  0x1a   :  { %s2985_s3 = smov 0   ;;  %s2987_s28 = smov 0  }
  0x1b   :  { %s2989_s29 = smov 0   ;;  %s2991_s0 = smov 0  }
  0x1c LB: > { %3489 = sst [smem:[#allocation17_spill]] %s2830_s25  ;;  %s3462_s22 = sadd.s32 4294967295, %s2854_s0   ;;  %s2854_s0 = sphi %s2991_s0, %s37_s0   ;;  %s2850_s29 = sphi %s2989_s29, %s3541_s29   ;;  %s2846_s28 = sphi %s2987_s28, %s3540_s28   ;;  %s2842_s3 = sphi %s2985_s3, %s3539_s3   ;;  %s2838_s27 = sphi %s2983_s27, %s3538_s27   ;;  %s2834_s26 = sphi %s2981_s26, %s3537_s26   ;;  %s2830_s25 = sphi %s2979_s25, %s3536_s25   ;;  %s2826_s2 = sphi %s2977_s2, %s3535_s2  }
  0x1d   : > { %3490 = sst [smem:[#allocation18_spill]] %s2834_s26  ;;  %p2332_p0 = scmp.ge.s32.totalorder %s2854_s0, 1 }
  0x1e   : > { %3491 = sst [smem:[#allocation19_spill]] %s2846_s28  ;;  %p3024_p1 = scmp.eq.s32.totalorder %s3462_s22, 0 }
  0x1f   : > { %3492 = sst [smem:[#allocation20_spill]] %s2850_s29  ;;  %p593_p2 = scmp.lt.s32.totalorder %s2854_s0, 5 }
  0x20   : > { %3493 = sst [smem:[#allocation21_spill]] %s2854_s0  ;;  %s2856_s24 = smov [#allocation9]  }
  0x21   : > { %s3494_s16 = sld [smem:[#allocation40_spill]]  ;;  %p3029_p3 = pnand %p2332_p0, %p593_p2 }
  0x22   : > { %s625_s4 = sshll.u32 %s2856_s24, 4  ;;  %s3497_s17 = sld [smem:[#allocation41_spill]]  ;;  %s626_s4 = int_to_ptr.vmem [resolvable:$true] %s625_s4 }
  0x23   : > { %p2455_p4 = pneg %p3029_p3  ;;  %s2857_s21 = smov [#allocation10]  }
  0x24   : > { %s637_s20 = sshll.u32 %s2857_s21, 4  ;;  %s3499_s30 = sld [smem:[#allocation28_spill]]  ;;  %s638_s20 = int_to_ptr.vmem [resolvable:$true] %s637_s20 }
  0x25   : > { %p3040_p5 = pnand %p2455_p4, %p3024_p1  ;;  %s2858_s14 = smov [#allocation5]  }
  0x26   : > { %s610_s13 = sshll.u32 %s2858_s14, 4  ;;  %s3500_s19 = sld [smem:[#allocation43_spill]]  ;;  %s611_s13 = int_to_ptr.vmem [resolvable:$true] %s610_s13 }
  0x27   : > { %s623_s5 = sshll.u32 %s3494_s16, 4  ;;  %s46_s14 = sadd.s32 1, %s2846_s28  ;;  %s624_s5 = int_to_ptr.hbm [resolvable:$true] %s623_s5 }
  0x28   : > { %s635_s18 = sshll.u32 %s3497_s17, 4  ;;  %p47_p6 = scmp.ge.s32.totalorder %s46_s14, 2  ;;  %s636_s18 = int_to_ptr.hbm [resolvable:$true] %s635_s18 }
  0x29   : > { %2461 = dma.hbm_to_vmem [thread:$0]  (!%p3040_p5), %s624_s5, 16, %s626_s4, [#allocation8]  }
  0x2a   : > { %2464 = dma.hbm_to_vmem [thread:$0]  (!%p3040_p5), %s636_s18, 16, %s638_s20, [#allocation11]  }
  0x2b   : > { %s608_s17 = sshll.u32 %s3499_s30, 4  ;;  %s2859_s18 = smov [#allocation12]   ;;  %s609_s17 = int_to_ptr.hbm [resolvable:$true] %s608_s17 }
  0x2c   : > { %s650_s5 = sshll.u32 %s3500_s19, 4  ;;  %s652_s20 = sshll.u32 %s2859_s18, 4  ;;  %s651_s5 = int_to_ptr.hbm [resolvable:$true] %s650_s5  ;;  %s653_s20 = int_to_ptr.vmem [resolvable:$true] %s652_s20 }
  0x2d   : > { %2458 = dma.hbm_to_vmem [thread:$0]  (!%p3040_p5), %s609_s17, 16, %s611_s13, [#allocation6]  }
  0x2e   : > { %2467 = dma.hbm_to_vmem [thread:$0]  (!%p3040_p5), %s651_s5, 16, %s653_s20, [#allocation11]  }
  0x2f   : > { %s49_s4 = sadd.s32 1, %s2850_s29  ;;  %p438_p7 = scmp.ne.s32.totalorder %s2834_s26, %s2830_s25 }
  0x30   : > { %p439_p8 = scmp.eq.s32.totalorder %s2854_s0, 0  ;;  %s3543_s14 = smov (%p47_p6, %s46_s14), 0 }
  0x31   : > { %3501 = sst [smem:[#allocation22_spill]] %s3543_s14  ;;  %s3545_s4 = smov (!%p47_p6, %s49_s4), %s2850_s29 }
  0x32   : > { %s428_s12 = ssub.s32 %s2846_s28, %s3543_s14  ;;  %s431_s13 = sadd.s32 1, %s2834_s26 }
  0x33   : > { %p51_p9 = scmp.ge.s32.totalorder %s3545_s4, 2  ;;  %p429_p10 = scmp.eq.s32.totalorder %s428_s12, 0 }
  0x34   : > { %p3069_p11 = por %p439_p8, %p438_p7  ;;  %p444_p12 = scmp.ne.s32.totalorder %s2830_s25, %s2826_s2 }
  0x35   : > { %s3547_s4 = smov (%p51_p9, %s3545_s4), 0  ;;  %p2476_p0 = scmp.lt.s32.totalorder %s2854_s0, 4 }
  0x36   : > { %3503 = sst [smem:[#allocation23_spill]] %s3547_s4  ;;  %p3082_p13 = por %p3024_p1, %p444_p12 }
  0x37   : > { %s3078_s22 = scalar_select %p429_p10, %s2834_s26, %s431_s13  }
  0x38   : > { %s745_s24 = sand.u32 1, %s2854_s0   ;;  %s747_s30 = sand.u32 1, %s2834_s26  }
  0x39   : > { %3504 = sst [smem:[#allocation24_spill]] %s3078_s22  ;;  %s748_s12 = scalar_lea.vmem [#allocation7], %s747_s30 }
  0x3a   : > { %s3506_s15 = sld [smem:[#allocation39_spill]]  ;;  %s755_s19 = sshll.u32 %s748_s12, 4  ;;  %s756_s19 = int_to_ptr.vmem [resolvable:$true] %s755_s19 }
  0x3b   : > { %p2469_p2 = pnand %p2476_p0, %p3069_p11  ;;  %s746_s2 = scalar_lea.sflag [#allocation8], %s745_s24 }
  0x3e   : > { %764 = sbr.rel (%p3029_p3) target bundleno = 2737 (0xab1), region = 100 }
  0x40   : > { %s751_s18 = scalar_lea.hbm %s3506_s15, %s2846_s28 }
  0x41   : > { %s753_s20 = sshll.u32 %s751_s18, 4  ;;  %s754_s20 = int_to_ptr.hbm [resolvable:$true] %s753_s20 }
  0x42   : > { %2471 = dma.hbm_to_vmem [thread:$0]  (!%p2469_p2), %s754_s20, 16, %s756_s19, %s746_s2  }
  0x43   : > { %2809 = dma.done.wait (%p3024_p1), [#allocation6], 16  }
  0x44   : > { %2811 = vsyncadd (%p3024_p1), [#allocation6], 4294967280  ;;  %s3507_s13 = sadd.s32 4294967295, %s2854_s0   ;;  %s773_s21 = sand.u32 1, %s2830_s25  }
  0x45   : > { %s771_s30 = sand.u32 1, %s3507_s13   ;;  %s3104_s17 = scalar_lea.vmem [#allocation7], %s773_s21 }
  0x46   : > { %s772_s5 = scalar_lea.sflag [#allocation8], %s771_s30  ;;  %3508 = sst [smem:[#allocation25_spill]] %s3104_s17 }
  0x47   : > { %2813 = dma.done.wait (%p3082_p13), %s772_s5, 16  }
  0x48   : > { %2815 = vsyncadd (%p3082_p13), %s772_s5, 4294967280 }
  0x49   : > { %2817 = dma.done.wait (%p3024_p1), [#allocation8], 16  }
  0x4a   : > { %2819 = vsyncadd (%p3024_p1), [#allocation8], 4294967280 }
  0x4b   : > { %2821 = dma.done.wait (%p3024_p1), [#allocation11], 32  }
  0x4c   : > { %2823 = vsyncadd (%p3024_p1), [#allocation11], 4294967264  ;;  %p903_p3 = scmp.lt.s32.totalorder %s2842_s3, 1  ;;  %p908_p4 = scmp.lt.s32.totalorder %s2838_s27, 1 }
  0x4d   : > { %s3509_s24 = sld [smem:[#allocation26_spill]]  ;;  %p2358_p1 = scmp.ne.s32.totalorder %s2838_s27, 0 }
  0x4e   : > { %s3549_s3 = smov (!%p903_p3, %s2842_s3), 1  ;;  %s3510_s13 = sld [smem:[#allocation30_spill]] }
  0x4f   : > { %s3122_s19 = scalar_select %p908_p4, %s2838_s27, 1 }
  0x50   : > { %s2421_s23 = sshll.u32 %s3549_s3, 4  ;;  %s3512_s6 = sld [smem:[#allocation32_spill]] }
  0x51   : > { %s2422_s20 = sshll.u32 %s3122_s19, 4  ;;  %s3513_s8 = sld [smem:[#allocation33_spill]] }
  0x52   : > { %s2425_s21 = sshll.u32 %s3122_s19, 5  ;;  %s3515_s10 = sld [smem:[#allocation34_spill]] }
  0x53   : > { %s907_s18 = scalar_lea.vmem %s3509_s24, %s2421_s23  ;;  %s3516_s1 = sld [smem:[#allocation36_spill]] }
  0x54   : > { %s3131_s30 = scalar_lea.vmem %s3510_s13, %s2422_s20  ;;  %s3518_s13 = sld [smem:[#allocation38_spill]] }
  0x55   : > { %s3519_s5 = sld [smem:[#allocation44_spill]]  ;;  %s2355_s4 = sshll.u32 %s3122_s19, 3 }
  0x56   : > { %s3140_s28 = scalar_lea.vmem %s3512_s6, %s2422_s20  ;;  %s3520_s22 = sld [smem:[#allocation45_spill]] }
  0x57   : > { %s3149_s26 = scalar_lea.vmem %s3513_s8, %s2422_s20  ;;  %s3517_s8 = sld [smem:[#allocation37_spill]] }
  0x58   : > { %s3163_s6 = scalar_lea.vmem %s3515_s10, %s2425_s21  ;;  %s960_s21 = sadd.s32 %s2421_s23, %s2355_s4 }
  0x59   : > { %s942_s16 = scalar_lea.vmem %s3516_s1, %s3122_s19  ;;  %s2357_s14 = sshll.u32 %s960_s21, 3 }
  0x5a   : > { %s948_s0 = scalar_lea.vmem %s3518_s13, %s3122_s19  ;;  %967 = sbr.rel (%p2358_p1) target bundleno = 318 (0x13e), region = 124 }
  0x5b   : > { %s3180_s29 = scalar_lea.vmem %s3519_s5, %s2421_s23  ;;  %s3521_s20 = sld [smem:[#allocation27_spill]] (!%p2358_p1) }
  0x5c   : > { %s3186_s1 = scalar_lea.vmem %s3520_s22, %s2357_s14  ;;  %s3522_s17 = sld [smem:[#allocation29_spill]] (!%p2358_p1) }
  0x5d   : > { %s945_s25 = scalar_lea.vmem %s3517_s8, %s3122_s19 }
  0x5f   : > { %vm1043_vm0 = vcmask 1043456   ;;  %v968_v1 = vld [vmem:[%s907_s18] sm:$0xff]  ;;  %v969_v2 = vld [vmem:[%s907_s18 + $0x8] sm:$0xff]  ;;  %vm970_vm1 = vcmask 64512   ;;  %v2860_v7 = vmov 16.0   ;;  %vm1015_vm3 = vcmask 57344  }
  0x60   : > { %v971_v4 = vsel %vm970_vm1, %v968_v1, 0.0  ;;  %v972_v5 = vsel %vm970_vm1, %v969_v2, 0.0  ;;  %2557 = vrcp.f32 %v2860_v7  ;;  %v2556_v59 = vld [vmem:[#allocation5] ss:$0 sm:$0xff]  ;;  %vm1065_vm10 = vcmask 261120  }
  0x61   : > { %v1035_v0 = vld [vmem:[%s3521_s20] sm:$0xf]  ;;  %v973_v6 = vadd.f32 %v972_v5, %v971_v4 }
  0x62   : > { %v1045_v3 = vsel %vm1043_vm0, %v1035_v0, 0  ;;  %v1061_v61 = vld [vmem:[%s3522_s17] sm:$0xff] }
  0x63   : > { %1054 = vmatpush.bf16.msra.mxu0 %v1045_v3  ;;  %v974_v8 = vrot.slane %v973_v6, 4 }
  0x65   : > { %v975_v9 = vadd.f32 %v974_v8, %v973_v6 }
  0x66   : > { %v2558_v10 = vpop.eup %2557 }
  0x67   : > { %v976_v11 = vrot.slane %v975_v9, 2  ;;  %v981_v12 = vmul.f32 16.0, %v2558_v10  ;;  %vm985_vm2 = vweird.f32 %v2558_v10 }
  0x69   : > { %v977_v13 = vadd.f32 %v976_v11, %v975_v9  ;;  %v982_v14 = vsub.f32 1.0, %v981_v12 }
  0x6b   : > { %v978_v15 = vrot.slane %v977_v13, 1  ;;  %v983_v16 = vmul.f32 %v2558_v10, %v982_v14 }
  0x6d   : > { %v979_v17 = vadd.f32 %v978_v15, %v977_v13  ;;  %v984_v18 = vadd.f32 %v2558_v10, %v983_v16 }
  0x6f   : > { %v986_v19 = vsel %vm985_vm2, %v2558_v10, %v984_v18 }
  0x70   : > { %v987_v20 = vmul.f32 %v986_v19, %v979_v17 }
  0x72   : > { %v988_v21 = vsub.f32 %v968_v1, %v987_v20  ;;  %v989_v22 = vsub.f32 %v969_v2, %v987_v20  ;;  %1016 = vst.msk [vmem:[#allocation3] sm:$0x1] %vm1015_vm3, %v987_v20  ;;  %v1062_v1 = vld [vmem:[%s3522_s17 + $0x8] sm:$0xff] }
  0x74   : > { %v990_v23 = vmul.f32 %v988_v21, %v988_v21  ;;  %v991_v24 = vmul.f32 %v989_v22, %v989_v22 }
  0x76   : > { %v992_v25 = vsel %vm970_vm1, %v990_v23, 0.0  ;;  %v993_v26 = vsel %vm970_vm1, %v991_v24, 0.0 }
  0x77   : > { %v994_v27 = vadd.f32 %v993_v26, %v992_v25 }
  0x79   : > { %v995_v28 = vrot.slane %v994_v27, 4 }
  0x7b   : > { %v996_v29 = vadd.f32 %v995_v28, %v994_v27 }
  0x7d   : > { %v997_v30 = vrot.slane %v996_v29, 2 }
  0x7f   : > { %v998_v31 = vadd.f32 %v997_v30, %v996_v29 }
  0x81   : > { %v999_v32 = vrot.slane %v998_v31, 1 }
  0x83   : > { %v1000_v33 = vadd.f32 %v999_v32, %v998_v31 }
  0x85   : > { %v1001_v34 = vmul.f32 %v1000_v33, %v986_v19 }
  0x87   : > { %v1002_v35 = vadd.f32 1e-05, %v1001_v34 }
  0x89   : > { %2559 = vrsqrt.f32 %v1002_v35  ;;  %vm1010_vm4 = vcmp.eq.f32.partialorder %v1002_v35, inf  ;;  %v1013_v42 = vand.u32 2147483648, %v1002_v35  ;;  %vm1012_vm5 = vcmp.eq.f32.partialorder %v1002_v35, 0.0 }
  0x8f   : > { %v2560_v36 = vpop.eup %2559 }
  0x90   : > { %v1004_v37 = vmul.f32 %v2560_v36, %v1002_v35 }
  0x92   : > { %v1005_v38 = vmul.f32 %v2560_v36, %v1004_v37 }
  0x94   : > { %v1006_v39 = vmul.f32 0.5, %v1005_v38 }
  0x96   : > { %v1007_v40 = vsub.f32 1.5, %v1006_v39 }
  0x98   : > { %v1008_v41 = vmul.f32 %v2560_v36, %v1007_v40 }
  0x9a   : > { %v1009_v43 = vmul.f32 %v1008_v41, %v1002_v35 }
  0x9c   : > { %v1011_v44 = vsel %vm1010_vm4, %v1002_v35, %v1009_v43 }
  0x9d   : > { %v1014_v45 = vsel %vm1012_vm5, %v1013_v42, %v1011_v44 }
  0x9e   : > { %1017 = vst.msk [vmem:[#allocation4] sm:$0x1] %vm1015_vm3, %v1014_v45  ;;  %2561 = vrcp.f32 %v1014_v45  ;;  %v1029_v48 = vand.u32 2147483648, %v1014_v45  ;;  %vm1023_vm6 = vweird.f32 %v1014_v45  ;;  %v1027_v50 = vand.u32 2147483647, %v1014_v45 }
  0xa0   : > { %v1030_v52 = vor.u32 1.1754944e-38, %v1029_v48  ;;  %vm1028_vm9 = vcmp.eq.f32.partialorder %v1027_v50, 8.507059e+37 }
  0xa4   : > { %v2562_v46 = vpop.eup %2561 }
  0xa5   : > { %v1019_v47 = vmul.f32 %v2562_v46, %v1014_v45  ;;  %vm1024_vm7 = vweird.f32 %v2562_v46 }
  0xa6   : > { %vm1025_vm8 = vmor %vm1023_vm6, %vm1024_vm7 }
  0xa7   : > { %v1020_v49 = vsub.f32 1.0, %v1019_v47 }
  0xa9   : > { %v1021_v51 = vmul.f32 %v2562_v46, %v1020_v49 }
  0xab   : > { %v1022_v53 = vadd.f32 %v2562_v46, %v1021_v51 }
  0xad   : > { %v1026_v54 = vsel %vm1025_vm8, %v2562_v46, %v1022_v53 }
  0xae   : > { %v1031_v55 = vsel %vm1028_vm9, %v1030_v52, %v1026_v54 }
  0xaf   : > { %v1032_v56 = vmul.f32 %v1031_v55, %v988_v21  ;;  %v1033_v57 = vmul.f32 %v1031_v55, %v989_v22 }
  0xb1   : > { %v1034_v58 = vpack.c.bf16 %v1033_v57, %v1032_v56 }
  0xb3   : > { %2359 = vmatmul.msk.bf16.vlgmr.msra.gmra.mxu0 %vm970_vm1, %v1034_v58 }
 0x130   : > { %v1056_v60 = vpop.f32.mrf.mxu0 }
 0x131   : > { %v1057_v62 = vadd.f32 %v2556_v59, %v1056_v60 }
 0x133   : > { %v1063_v63 = vadd.f32 %v1061_v61, %v1057_v62 }
 0x135   : > { %1066 = vst.msk [vmem:[#allocation2] sm:$0xff] %vm1065_vm10, %v1063_v63 }
 0x138   : > { %v1058_v0 = vpop.f32.mrf.mxu0 }
 0x139   : > { %v1059_v2 = vadd.f32 %v2556_v59, %v1058_v0 }
 0x13b   : > { %v1064_v3 = vadd.f32 %v1062_v1, %v1059_v2 }
 0x13d   : > { %1067 = vst.msk [vmem:[#allocation2 + $0x8] sm:$0xff] %vm1065_vm10, %v1064_v3 }
 0x13e PF: > { %v2428_v4 = vld [vmem:[%s3131_s30 + $0x8] sm:$0xff]  ;;  %v2427_v5 = vld [vmem:[%s3131_s30] sm:$0xff]  ;;  %vm1091_vm11 = vcmask 261120   ;;  %s3523_s12 = sld [smem:[#allocation31_spill]]  ;;  %s2861_s30 = smov 104   ;;  %vm1165_vm12 = vcmask 64512  }
 0x13f   : > { %v3207_v6 = vld [vmem:[#allocation2] sm:$0xff]  ;;  %1101 = vmatpush.bf16.msra.mxu0 %v2428_v4  ;;  %s2862_s15 = smov 112   ;;  %s2863_s5 = smov 120   ;;  %vm1282_vm13 = vcmask 130048   ;;  %vm1507_vm14 = vcmask 1043456  }
 0x140   : > { %s2864_s4 = smov 96   ;;  %s2865_s21 = smov 64  }
 0x141   : > { %s3525_s22 = scalar_lea.vmem %s3445_s7, %s3122_s19  ;;  %s3528_s23 = scalar_lea.vmem %s3447_s9, %s3122_s19 }
 0x142   : > { %s3529_s18 = sld [smem:[#allocation35_spill]]  ;;  %p2409_p5 = scmp.ne.s32.totalorder %s2838_s27, 1 }
 0x143   : > { %1102 = vmatpush.bf16.msra.mxu0 %v2427_v5  ;;  %s3531_s24 = sld [smem:[#allocation25_spill]] }
 0x144   : > { %v3209_v7 = vld [vmem:[#allocation2 + $0x8] sm:$0xff]  ;;  %s3524_s2 = scalar_lea.vmem %s3523_s12, %s3122_s19 }
 0x145   : > { %v1070_v8 = vpack.c.bf16 %v3209_v7, %v3207_v6  ;;  %v2563_v9 = vld [vmem:[%s3524_s2] ss:$0 sm:$0xff] }
 0x147   : > { %2368 = vmatmul.msk.bf16.vlgmr.msra.gmra.mxu0 %vm1091_vm11, %v1070_v8 }
 0x148   : > { %s3530_s13 = scalar_lea.vmem %s3529_s18, %s3122_s19  ;;  %s3533_s19 = sld [smem:[#allocation42_spill]] (!%p2409_p5) }
 0x1c4   : > { %v1104_v10 = vpop.f32.mrf.mxu0 }
 0x1c5   : > { %v1105_v11 = vadd.f32 %v2563_v9, %v1104_v10 }
 0x1c7   : > { %1123 = vrot.lane.b32.xlu2 %v1105_v11, %s2861_s30  ;;  %1117 = vrot.lane.b32.xlu1 %v1105_v11, %s2862_s15  ;;  %v1129_v12 = vmul.f32 0.35355338, %v1105_v11  ;;  %v1145_v15 = vpack.c.bf16 %v1105_v11, %v1105_v11 }
 0x1c8   : > { %1111 = vrot.lane.b32.xlu0 %v1105_v11, %s2863_s5 }
 0x1c9   : > { %v1137_v18 = vpack.c.bf16 %v1129_v12, %v1129_v12  ;;  %v1160_v21 = vunpack.c.l.b16 %v1145_v15 }
 0x1cb   : > { %v1155_v22 = vunpack.c.l.b16 %v1137_v18 }
 0x1cc   : > { %v1106_v13 = vpop.f32.mrf.mxu0 }
 0x1cd   : > { %v1107_v14 = vadd.f32 %v2563_v9, %v1106_v13 }
 0x1cf   : > { %1125 = vrot.lane.b32.xlu2 %v1107_v14, %s2861_s30  ;;  %1119 = vrot.lane.b32.xlu1 %v1107_v14, %s2862_s15  ;;  %v1146_v16 = vpack.c.bf16 %v1107_v14, %v1107_v14  ;;  %v1130_v17 = vmul.f32 0.35355338, %v1107_v14 }
 0x1d0   : > { %1113 = vrot.lane.b32.xlu0 %v1107_v14, %s2863_s5 }
 0x1d1   : > { %v1161_v19 = vunpack.c.l.b16 %v1146_v16  ;;  %v1138_v20 = vpack.c.bf16 %v1130_v17, %v1130_v17 }
 0x1d3   : > { %v1156_v23 = vunpack.c.l.b16 %v1138_v20  ;;  %v3219_v24 = vpack.c.b16 %v1161_v19, %v1160_v21 }
 0x1d5   : > { %v1157_v25 = vpack.c.b16 %v1156_v23, %v1155_v22 }
 0x1d7   : > { %1163 = vrot.lane.b32.xlu2 %v3219_v24, %s2864_s4 }
 0x221   : > { %v1124_v26 = vpop.permute.xlu2 %1123 }
 0x222   : > { %v1135_v27 = vmul.f32 0.35355338, %v1124_v26  ;;  %v1151_v52 = vpack.c.bf16 %v1124_v26, %v1124_v26 }
 0x224   : > { %v1143_v29 = vpack.c.bf16 %v1135_v27, %v1135_v27  ;;  %v1257_v54 = vunpack.c.l.b16 %v1151_v52 }
 0x226   : > { %v1252_v32 = vunpack.c.l.b16 %v1143_v29 }
 0x229   : > { %v1126_v28 = vpop.permute.xlu2 %1125 }
 0x22a   : > { %v1136_v30 = vmul.f32 0.35355338, %v1126_v28  ;;  %v1152_v50 = vpack.c.bf16 %v1126_v28, %v1126_v28 }
 0x22c   : > { %v1144_v31 = vpack.c.bf16 %v1136_v30, %v1136_v30  ;;  %v1258_v53 = vunpack.c.l.b16 %v1152_v50 }
 0x22e   : > { %v1253_v33 = vunpack.c.l.b16 %v1144_v31  ;;  %v3233_v55 = vpack.c.b16 %v1258_v53, %v1257_v54 }
 0x230   : > { %v1254_v34 = vpack.c.b16 %v1253_v33, %v1252_v32 }
 0x231   : > { %v1164_v35 = vpop.permute.xlu2 %1163 }
 0x232   : > { %v1170_v36 = vsel %vm1165_vm12, %v1164_v35, 0 }
 0x233   : > { %1179 = vmatpush.bf16.xpose.msra.mxu1 %v1170_v36 }
 0x239   : > { %v1118_v37 = vpop.permute.xlu1 %1117 }
 0x23a   : > { %v1112_v38 = vpop.permute.xlu0 %1111  ;;  %2369 = vmatmul.msk.bf16.vlgmr.msra.gmra.mxu1 %vm1165_vm12, %v1157_v25  ;;  %v1149_v39 = vpack.c.bf16 %v1118_v37, %v1118_v37  ;;  %v1133_v58 = vmul.f32 0.35355338, %v1118_v37 }
 0x23b   : > { %v1147_v40 = vpack.c.bf16 %v1112_v38, %v1112_v38  ;;  %v1131_v60 = vmul.f32 0.35355338, %v1112_v38 }
 0x23c   : > { %v1225_v45 = vunpack.c.l.b16 %v1149_v39  ;;  %v1141_v1 = vpack.c.bf16 %v1133_v58, %v1133_v58 }
 0x23d   : > { %v1193_v47 = vunpack.c.l.b16 %v1147_v40  ;;  %v1139_v4 = vpack.c.bf16 %v1131_v60, %v1131_v60 }
 0x23e   : > { %v1220_v10 = vunpack.c.l.b16 %v1141_v1 }
 0x23f   : > { %v1188_v11 = vunpack.c.l.b16 %v1139_v4 }
 0x241   : > { %v1120_v41 = vpop.permute.xlu1 %1119 }
 0x242   : > { %v1150_v42 = vpack.c.bf16 %v1120_v41, %v1120_v41  ;;  %v1114_v43 = vpop.permute.xlu0 %1113  ;;  %v1134_v56 = vmul.f32 0.35355338, %v1120_v41 }
 0x243   : > { %v1148_v44 = vpack.c.bf16 %v1114_v43, %v1114_v43  ;;  %v1132_v57 = vmul.f32 0.35355338, %v1114_v43 }
 0x244   : > { %v1226_v46 = vunpack.c.l.b16 %v1150_v42  ;;  %v1142_v62 = vpack.c.bf16 %v1134_v56, %v1134_v56 }
 0x245   : > { %v1194_v48 = vunpack.c.l.b16 %v1148_v44  ;;  %v1140_v63 = vpack.c.bf16 %v1132_v57, %v1132_v57 }
 0x246   : > { %v3225_v49 = vpack.c.b16 %v1226_v46, %v1225_v45  ;;  %v1221_v8 = vunpack.c.l.b16 %v1142_v62 }
 0x247   : > { %v3227_v51 = vpack.c.b16 %v1194_v48, %v1193_v47  ;;  %v1189_v9 = vunpack.c.l.b16 %v1140_v63 }
 0x248   : > { %1228 = vrot.lane.b32.xlu1 %v3225_v49, %s2864_s4  ;;  %v1222_v12 = vpack.c.b16 %v1221_v8, %v1220_v10 }
 0x249   : > { %1196 = vrot.lane.b32.xlu0 %v3227_v51, %s2864_s4  ;;  %v1190_v13 = vpack.c.b16 %v1189_v9, %v1188_v11 }
 0x251   : > { %1260 = vrot.lane.b32.xlu0 %v3233_v55, %s2864_s4 }
 0x2b7   : > { %v1181_v59 = vpop.f32.mrf.mxu1 }
 0x2b8   : > { %v1283_v61 = vsel %vm1282_vm13, %v1181_v59, -inf }
 0x2b9   : > { %1284 = vmax.xlane.f32.xlu1 %v1283_v61 }
 0x2ba   : > { %v1229_v0 = vpop.permute.xlu1 %1228 }
 0x2bb   : > { %v1197_v2 = vpop.permute.xlu0 %1196  ;;  %v1234_v3 = vsel %vm1165_vm12, %v1229_v0, 0 }
 0x2bc   : > { %v1202_v5 = vsel %vm1165_vm12, %v1197_v2, 0  ;;  %1243 = vmatpush.bf16.xpose.msra.mxu3 %v1234_v3 }
 0x2bd   : > { %1211 = vmatpush.bf16.xpose.msra.mxu2 %v1202_v5 }
 0x2c3   : > { %v1261_v14 = vpop.permute.xlu0 %1260  ;;  %2371 = vmatmul.msk.bf16.vlgmr.msra.gmra.mxu3 %vm1165_vm12, %v1222_v12 }
 0x2c4   : > { %2370 = vmatmul.msk.bf16.vlgmr.msra.gmra.mxu2 %vm1165_vm12, %v1190_v13  ;;  %v1266_v15 = vsel %vm1165_vm12, %v1261_v14, 0 }
 0x2c5   : > { %1275 = vmatpush.bf16.xpose.msrb.mxu0 %v1266_v15 }
 0x2cc   : > { %2372 = vmatmul.msk.bf16.vlgmr.msrb.gmra.mxu0 %vm1165_vm12, %v1254_v34  ;;  %v1183_v34 = vpop.f32.mrf.mxu1 }
 0x2cd   : > { %v1286_v35 = vsel %vm1282_vm13, %v1183_v34, -inf }
 0x32c   : > { %v1285_v16 = vpop.xlane.xlu1 %1284 }
 0x32d   : > { %v1307_v17 = vsub.f32 %v1181_v59, %v1285_v16 }
 0x32f   : > { %v1315_v23 = vmul.f32 1.442695, %v1307_v17 }
 0x331   : > { %2571 = vpow2.f32 %v1315_v23 }
 0x337   : > { %v2572_v30 = vpop.eup %2571 }
 0x338   : > { %v1331_v32 = vsel %vm1282_vm13, %v2572_v30, 0.0 }
 0x346   : > { %v1245_v18 = vpop.f32.mrf.mxu3 }
 0x347   : > { %v1213_v19 = vpop.f32.mrf.mxu2  ;;  %v1295_v20 = vsel %vm1282_vm13, %v1245_v18, -inf }
 0x348   : > { %1296 = vmax.xlane.f32.xlu0 %v1295_v20  ;;  %v1289_v21 = vsel %vm1282_vm13, %v1213_v19, -inf }
 0x349   : > { %v1277_v22 = vpop.f32.mrf.mxu0  ;;  %1290 = vmax.xlane.f32.xlu1 %v1289_v21 }
 0x34a   : > { %v1301_v26 = vsel %vm1282_vm13, %v1277_v22, -inf }
 0x34e   : > { %v1247_v31 = vpop.f32.mrf.mxu3 }
 0x34f   : > { %v1215_v25 = vpop.f32.mrf.mxu2  ;;  %v1298_v33 = vsel %vm1282_vm13, %v1247_v31, -inf }
 0x350   : > { %1302 = vmax.xlane.f32.xlu0 %v1301_v26  ;;  %v1292_v27 = vsel %vm1282_vm13, %v1215_v25, -inf }
 0x351   : > { %v1279_v28 = vpop.f32.mrf.mxu0  ;;  %1293 = vmax.xlane.f32.xlu2 %v1292_v27 }
 0x352   : > { %v1304_v29 = vsel %vm1282_vm13, %v1279_v28, -inf }
 0x353   : > { %1305 = vmax.xlane.f32.xlu1 %v1304_v29 }
 0x358   : > { %1332 = vadd.xlane.f32.xlu0 %v1331_v32 }
 0x359   : > { %1299 = vmax.xlane.f32.xlu2 %v1298_v33 }
 0x361   : > { %1287 = vmax.xlane.f32.xlu2 %v1286_v35 }
 0x3bb   : > { %v1297_v36 = vpop.xlane.xlu0 %1296 }
 0x3bc   : > { %v1291_v37 = vpop.xlane.xlu1 %1290  ;;  %v1311_v60 = vsub.f32 %v1245_v18, %v1297_v36 }
 0x3bd   : > { %v1309_v38 = vsub.f32 %v1213_v19, %v1291_v37 }
 0x3be   : > { %v1323_v63 = vmul.f32 1.442695, %v1311_v60 }
 0x3bf   : > { %v1319_v39 = vmul.f32 1.442695, %v1309_v38 }
 0x3c1   : > { %2573 = vpow2.f32 %v1319_v39 }
 0x3c3   : > { %v1303_v40 = vpop.xlane.xlu0 %1302 }
 0x3c4   : > { %v1294_v41 = vpop.xlane.xlu2 %1293  ;;  %v1313_v1 = vsub.f32 %v1277_v22, %v1303_v40 }
 0x3c5   : > { %v1310_v42 = vsub.f32 %v1215_v25, %v1294_v41 }
 0x3c6   : > { %v1327_v3 = vmul.f32 1.442695, %v1313_v1  ;;  %v1306_v4 = vpop.xlane.xlu1 %1305 }
 0x3c7   : > { %v2574_v43 = vpop.eup %2573  ;;  %v1321_v44 = vmul.f32 1.442695, %v1310_v42  ;;  %v1314_v8 = vsub.f32 %v1279_v28, %v1306_v4 }
 0x3c8   : > { %v1337_v45 = vsel %vm1282_vm13, %v2574_v43, 0.0 }
 0x3c9   : > { %2575 = vpow2.f32 %v1321_v44  ;;  %1338 = vadd.xlane.f32.xlu2 %v1337_v45  ;;  %v1329_v10 = vmul.f32 1.442695, %v1314_v8 }
 0x3cb   : > { %v1333_v46 = vpop.xlane.xlu0 %1332 }
 0x3cc   : > { %v1300_v47 = vpop.xlane.xlu2 %1299  ;;  %2577 = vrcp.f32 %v1333_v46 }
 0x3cd   : > { %v1312_v48 = vsub.f32 %v1247_v31, %v1300_v47 }
 0x3cf   : > { %v2576_v50 = vpop.eup %2575  ;;  %v1325_v52 = vmul.f32 1.442695, %v1312_v48 }
 0x3d0   : > { %v1340_v53 = vsel %vm1282_vm13, %v2576_v50, 0.0 }
 0x3d1   : > { %2579 = vpow2.f32 %v1325_v52  ;;  %1341 = vadd.xlane.f32.xlu0 %v1340_v53 }
 0x3d2   : > { %v2578_v54 = vpop.eup %2577 }
 0x3d3   : > { %v3254_v56 = vmul.f32 %v2578_v54, %v2572_v30 }
 0x3d4   : > { %v1288_v57 = vpop.xlane.xlu2 %1287 }
 0x3d5   : > { %1371 = vst.msk [vmem:[%s3186_s1] sm:$0xff] %vm1282_vm13, %v3254_v56  ;;  %v1308_v58 = vsub.f32 %v1183_v34, %v1288_v57  ;;  %v1379_v54 = vpack.c.bf16 %v3254_v56, %v3254_v56 }
 0x3d7   : > { %v2580_v59 = vpop.eup %2579  ;;  %v1317_v61 = vmul.f32 1.442695, %v1308_v58 }
 0x3d8   : > { %v1346_v62 = vsel %vm1282_vm13, %v2580_v59, 0.0 }
 0x3d9   : > { %2581 = vpow2.f32 %v1317_v61  ;;  %1347 = vadd.xlane.f32.xlu2 %v1346_v62  ;;  %v1496_v61 = vld [vmem:[%s3140_s28 + $0x4] sm:$0xf] }
 0x3da   : > { %2583 = vpow2.f32 %v1323_v63  ;;  %v1534_v62 = vsel %vm1507_vm14, %v1496_v61, 0  ;;  %v1497_v63 = vld [vmem:[%s3140_s28 + $0x8] sm:$0xf] }
 0x3db   : > { %2585 = vpow2.f32 %v1327_v3  ;;  %v1498_v3 = vld [vmem:[%s3140_s28 + $0xc] sm:$0xf] }
 0x3dc   : > { %2587 = vpow2.f32 %v1329_v10 }
 0x3df   : > { %v2582_v0 = vpop.eup %2581 }
 0x3e0   : > { %v1334_v2 = vsel %vm1282_vm13, %v2582_v0, 0.0  ;;  %v2584_v5 = vpop.eup %2583 }
 0x3e1   : > { %1335 = vadd.xlane.f32.xlu1 %v1334_v2  ;;  %v1343_v9 = vsel %vm1282_vm13, %v2584_v5, 0.0  ;;  %v2586_v11 = vpop.eup %2585 }
 0x3e2   : > { %v1349_v12 = vsel %vm1282_vm13, %v2586_v11, 0.0  ;;  %v2588_v13 = vpop.eup %2587 }
 0x3e5   : > { %1442 = vrot.lane.b32.xlu0 %v3225_v49, %s2865_s21  ;;  %v1352_v49 = vsel %vm1282_vm13, %v2588_v13, 0.0 }
 0x3e9   : > { %1344 = vadd.xlane.f32.xlu1 %v1343_v9 }
 0x3ed   : > { %1467 = vrot.lane.b32.xlu0 %v3233_v55, %s2865_s21 }
 0x3f1   : > { %1417 = vrot.lane.b32.xlu2 %v3227_v51, %s2865_s21  ;;  %1350 = vadd.xlane.f32.xlu1 %v1349_v12  ;;  %v1495_v12 = vld [vmem:[%s3140_s28] sm:$0xf] }
 0x3f9   : > { %1353 = vadd.xlane.f32.xlu1 %v1352_v49 }
 0x412   : > { %1392 = vrot.lane.b32.xlu1 %v3219_v24, %s2865_s21 }
 0x43c   : > { %v1339_v14 = vpop.xlane.xlu2 %1338 }
 0x43d   : > { %2589 = vrcp.f32 %v1339_v14 }
 0x443   : > { %v2590_v15 = vpop.eup %2589 }
 0x444   : > { %v1365_v16 = vmul.f32 %v2590_v15, %v2574_v43  ;;  %v1342_v17 = vpop.xlane.xlu0 %1341 }
 0x445   : > { %2591 = vrcp.f32 %v1342_v17 }
 0x446   : > { %1373 = vst.msk [vmem:[%s3186_s1 + $0x10] sm:$0xff] %vm1282_vm13, %v1365_v16  ;;  %v1381_v20 = vpack.c.bf16 %v1365_v16, %v1365_v16 }
 0x448   : > { %v1414_v26 = vunpack.c.l.b16 %v1381_v20 }
 0x44b   : > { %v2592_v55 = vpop.eup %2591 }
 0x44c   : > { %v1366_v18 = vmul.f32 %v2592_v55, %v2576_v50  ;;  %v1348_v51 = vpop.xlane.xlu2 %1347 }
 0x44d   : > { %2593 = vrcp.f32 %v1348_v51 }
 0x44e   : > { %1374 = vst.msk [vmem:[%s3186_s1 + $0x18] sm:$0xff] %vm1282_vm13, %v1366_v18  ;;  %v1382_v19 = vpack.c.bf16 %v1366_v18, %v1366_v18 }
 0x450   : > { %v1415_v21 = vunpack.c.l.b16 %v1382_v19 }
 0x452   : > { %v1416_v27 = vpack.c.b16 %v1415_v21, %v1414_v26 }
 0x453   : > { %v2594_v22 = vpop.eup %2593 }
 0x454   : > { %v1368_v24 = vmul.f32 %v2594_v22, %v2580_v59  ;;  %v1336_v23 = vpop.xlane.xlu1 %1335  ;;  %v1418_v25 = vpop.permute.xlu2 %1417  ;;  %v1389_v59 = vunpack.c.l.b16 %v1379_v54 }
 0x455   : > { %2595 = vrcp.f32 %v1336_v23  ;;  %1430 = vmatpush.bf16.msrb.mxu2 %v1418_v25 }
 0x456   : > { %1376 = vst.msk [vmem:[%s3186_s1 + $0x28] sm:$0xff] %vm1282_vm13, %v1368_v24  ;;  %v1384_v34 = vpack.c.bf16 %v1368_v24, %v1368_v24 }
 0x457   : > { %v1443_v28 = vpop.permute.xlu0 %1442 }
 0x458   : > { %2374 = vmatmul.msk.bf16.vlgmr.msrb.gmra.mxu2 %vm1282_vm13, %v1416_v27  ;;  %1455 = vmatpush.bf16.msrb.mxu3 %v1443_v28  ;;  %v1440_v39 = vunpack.c.l.b16 %v1384_v34 }
 0x459   : > { %1543 = vmatpush.bf16.msra.mxu2 %v1534_v62 }
 0x45b   : > { %v2596_v29 = vpop.eup %2595 }
 0x45c   : > { %v1364_v30 = vmul.f32 %v2596_v29, %v2582_v0  ;;  %v1345_v31 = vpop.xlane.xlu1 %1344  ;;  %v1559_v0 = vsel %vm1507_vm14, %v1497_v63, 0 }
 0x45d   : > { %2597 = vrcp.f32 %v1345_v31  ;;  %1568 = vmatpush.bf16.msra.mxu3 %v1559_v0  ;;  %v2866_v0 = vmov 32.0  }
 0x45e   : > { %1372 = vst.msk [vmem:[%s3186_s1 + $0x8] sm:$0xff] %vm1282_vm13, %v1364_v30  ;;  %v1380_v53 = vpack.c.bf16 %v1364_v30, %v1364_v30 }
 0x45f   : > { %v1468_v32 = vpop.permute.xlu0 %1467 }
 0x460   : > { %1480 = vmatpush.bf16.msra.mxu0 %v1468_v32  ;;  %v1390_v57 = vunpack.c.l.b16 %v1380_v53 }
 0x462   : > { %v1391_v60 = vpack.c.b16 %v1390_v57, %v1389_v59 }
 0x463   : > { %v2598_v33 = vpop.eup %2597 }
 0x464   : > { %v1367_v35 = vmul.f32 %v2598_v33, %v2584_v5  ;;  %v1351_v36 = vpop.xlane.xlu1 %1350  ;;  %v1584_v5 = vsel %vm1507_vm14, %v1498_v3, 0 }
 0x465   : > { %2599 = vrcp.f32 %v1351_v36  ;;  %1593 = vmatpush.bf16.msrb.mxu0 %v1584_v5 }
 0x466   : > { %1375 = vst.msk [vmem:[%s3186_s1 + $0x20] sm:$0xff] %vm1282_vm13, %v1367_v35  ;;  %v1383_v37 = vpack.c.bf16 %v1367_v35, %v1367_v35 }
 0x468   : > { %v1439_v38 = vunpack.c.l.b16 %v1383_v37 }
 0x46a   : > { %v1441_v40 = vpack.c.b16 %v1440_v39, %v1439_v38 }
 0x46b   : > { %v2600_v41 = vpop.eup %2599 }
 0x46c   : > { %v1369_v42 = vmul.f32 %v2600_v41, %v2586_v11  ;;  %v1354_v43 = vpop.xlane.xlu1 %1353  ;;  %2375 = vmatmul.msk.bf16.vlgmr.msrb.gmra.mxu3 %vm1282_vm13, %v1441_v40  ;;  %v2564_v40 = vld [vmem:[%s3525_s22] ss:$0 sm:$0xff] }
 0x46d   : > { %2601 = vrcp.f32 %v1354_v43 }
 0x46e   : > { %1377 = vst.msk [vmem:[%s3186_s1 + $0x30] sm:$0xff] %vm1282_vm13, %v1369_v42  ;;  %v1385_v45 = vpack.c.bf16 %v1369_v42, %v1369_v42  ;;  %2603 = vrcp.f32 %v2866_v0 }
 0x470   : > { %v1464_v48 = vunpack.c.l.b16 %v1385_v45 }
 0x473   : > { %v2602_v44 = vpop.eup %2601 }
 0x474   : > { %v1370_v46 = vmul.f32 %v2602_v44, %v2588_v13  ;;  %v1509_v13 = vsel %vm1507_vm14, %v1495_v12, 0 }
 0x476   : > { %1378 = vst.msk [vmem:[%s3186_s1 + $0x38] sm:$0xff] %vm1282_vm13, %v1370_v46  ;;  %v1386_v47 = vpack.c.bf16 %v1370_v46, %v1370_v46 }
 0x478   : > { %v1465_v50 = vunpack.c.l.b16 %v1386_v47 }
 0x47a   : > { %v1466_v52 = vpack.c.b16 %v1465_v50, %v1464_v48 }
 0x47c   : > { %2376 = vmatmul.msk.bf16.vlgmr.msra.gmra.mxu0 %vm1282_vm13, %v1466_v52 }
 0x484   : > { %v1393_v58 = vpop.permute.xlu1 %1392 }
 0x485   : > { %1405 = vmatpush.bf16.msrb.mxu1 %v1393_v58 }
 0x488   : > { %2373 = vmatmul.msk.bf16.vlgmr.msrb.gmra.mxu1 %vm1282_vm13, %v1391_v60 }
 0x489   : > { %1518 = vmatpush.bf16.msra.mxu1 %v1509_v13 }
 0x4db   : > { %v1432_v1 = vpop.f32.mrf.mxu2 }
 0x4dc   : > { %v1489_v56 = vpack.c.bf16 %v1432_v1, %v1432_v1  ;;  %v2604_v1 = vpop.eup %2603 }
 0x4dd   : > { %vm1635_vm15 = vweird.f32 %v2604_v1 }
 0x4de   : > { %v1527_v8 = vunpack.c.l.b16 %v1489_v56  ;;  %v1631_v56 = vmul.f32 32.0, %v2604_v1 }
 0x4e3   : > { %v1434_v2 = vpop.f32.mrf.mxu2 }
 0x4e4   : > { %v1490_v4 = vpack.c.bf16 %v1434_v2, %v1434_v2 }
 0x4e6   : > { %v1528_v9 = vunpack.c.l.b16 %v1490_v4 }
 0x4e8   : > { %v1529_v10 = vpack.c.b16 %v1528_v9, %v1527_v8 }
 0x4ea   : > { %2378 = vmatmul.msk.bf16.vlgmr.msra.gmra.mxu2 %vm1165_vm12, %v1529_v10 }
 0x4ef   : > { %v1457_v11 = vpop.f32.mrf.mxu3 }
 0x4f0   : > { %v1491_v49 = vpack.c.bf16 %v1457_v11, %v1457_v11 }
 0x4f2   : > { %v1552_v17 = vunpack.c.l.b16 %v1491_v49 }
 0x4f7   : > { %v1459_v14 = vpop.f32.mrf.mxu3 }
 0x4f8   : > { %v1492_v15 = vpack.c.bf16 %v1459_v14, %v1459_v14 }
 0x4f9   : > { %v1482_v16 = vpop.f32.mrf.mxu0 }
 0x4fa   : > { %v1553_v55 = vunpack.c.l.b16 %v1492_v15  ;;  %v1493_v51 = vpack.c.bf16 %v1482_v16, %v1482_v16  ;;  %v2430_v15 = vld [vmem:[%s3149_s26 + $0x8] sm:$0xff] }
 0x4fb   : > { %1715 = vmatpush.bf16.msrb.mxu1 %v2430_v15 }
 0x4fc   : > { %v1554_v18 = vpack.c.b16 %v1553_v55, %v1552_v17  ;;  %v1577_v21 = vunpack.c.l.b16 %v1493_v51  ;;  %v2429_v55 = vld [vmem:[%s3149_s26] sm:$0xff] }
 0x4fe   : > { %2379 = vmatmul.msk.bf16.vlgmr.msra.gmra.mxu3 %vm1165_vm12, %v1554_v18 }
 0x4ff   : > { %1716 = vmatpush.bf16.msrb.mxu1 %v2429_v55  ;;  %v2432_v55 = vld [vmem:[%s3163_s6 + $0x8] sm:$0xff] }
 0x501   : > { %v1484_v19 = vpop.f32.mrf.mxu0 }
 0x502   : > { %v1494_v20 = vpack.c.bf16 %v1484_v19, %v1484_v19 }
 0x504   : > { %v1578_v22 = vunpack.c.l.b16 %v1494_v20 }
 0x505   : > { %v1407_v24 = vpop.f32.mrf.mxu1 }
 0x506   : > { %v1579_v23 = vpack.c.b16 %v1578_v22, %v1577_v21  ;;  %v1487_v25 = vpack.c.bf16 %v1407_v24, %v1407_v24 }
 0x508   : > { %2380 = vmatmul.msk.bf16.vlgmr.msrb.gmra.mxu0 %vm1165_vm12, %v1579_v23  ;;  %v1501_v28 = vunpack.c.l.b16 %v1487_v25 }
 0x50d   : > { %v1409_v26 = vpop.f32.mrf.mxu1 }
 0x50e   : > { %v1488_v27 = vpack.c.bf16 %v1409_v26, %v1409_v26 }
 0x510   : > { %v1502_v29 = vunpack.c.l.b16 %v1488_v27 }
 0x512   : > { %v1503_v30 = vpack.c.b16 %v1502_v29, %v1501_v28 }
 0x514   : > { %2377 = vmatmul.msk.bf16.vlgmr.msra.gmra.mxu1 %vm1165_vm12, %v1503_v30 }
 0x56d   : > { %v1545_v31 = vpop.f32.mrf.mxu2 }
 0x56e   : > { %v1601_v35 = vsel %vm1091_vm11, %v1545_v31, 0.0 }
 0x575   : > { %v1547_v42 = vpop.f32.mrf.mxu2 }
 0x576   : > { %v1608_v47 = vsel %vm1091_vm11, %v1547_v42, 0.0 }
 0x581   : > { %v1570_v32 = vpop.f32.mrf.mxu3 }
 0x582   : > { %v1603_v38 = vsel %vm1091_vm11, %v1570_v32, 0.0 }
 0x585   : > { %v1595_v33 = vpop.f32.mrf.mxu0 }
 0x586   : > { %v1605_v41 = vsel %vm1091_vm11, %v1595_v33, 0.0  ;;  %v2565_v33 = vld [vmem:[%s942_s16] ss:$0 sm:$0xff] }
 0x589   : > { %v1572_v44 = vpop.f32.mrf.mxu3 }
 0x58a   : > { %v1610_v54 = vsel %vm1091_vm11, %v1572_v44, 0.0  ;;  %v2567_v44 = vld [vmem:[%s3528_s23] ss:$0 sm:$0xff] }
 0x58d   : > { %v1597_v50 = vpop.f32.mrf.mxu0 }
 0x58e   : > { %v1612_v59 = vsel %vm1091_vm11, %v1597_v50, 0.0 }
 0x591   : > { %v1520_v34 = vpop.f32.mrf.mxu1 }
 0x592   : > { %v1600_v36 = vsel %vm1091_vm11, %v1520_v34, 0.0 }
 0x593   : > { %v1602_v37 = vadd.f32 %v1601_v35, %v1600_v36 }
 0x595   : > { %v1604_v39 = vadd.f32 %v1603_v38, %v1602_v37  ;;  %v2566_v37 = vld [vmem:[%s945_s25] ss:$0 sm:$0xff] }
 0x597   : > { %v1606_v43 = vadd.f32 %v1605_v41, %v1604_v39 }
 0x599   : > { %v1522_v45 = vpop.f32.mrf.mxu1  ;;  %v1618_v46 = vadd.f32 %v2564_v40, %v1606_v43 }
 0x59a   : > { %v1607_v48 = vsel %vm1091_vm11, %v1522_v45, 0.0 }
 0x59b   : > { %v1609_v52 = vadd.f32 %v1608_v47, %v1607_v48  ;;  %v1620_v53 = vadd.f32 %v1618_v46, %v3207_v6  ;;  %v1632_v6 = vsub.f32 1.0, %v1631_v56 }
 0x59d   : > { %v1611_v57 = vadd.f32 %v1610_v54, %v1609_v52  ;;  %v1624_v58 = vsel %vm1091_vm11, %v1620_v53, 0.0  ;;  %v1633_v2 = vmul.f32 %v2604_v1, %v1632_v6  ;;  %v2434_v6 = vld [vmem:[%s3163_s6 + $0x18] sm:$0xff] }
 0x59e   : > { %1625 = vadd.xlane.f32.xlu2 %v1624_v58  ;;  %1856 = vmatpush.bf16.msrb.mxu2 %v2434_v6 }
 0x59f   : > { %v1613_v60 = vadd.f32 %v1612_v59, %v1611_v57  ;;  %v1634_v3 = vadd.f32 %v2604_v1, %v1633_v2 }
 0x5a1   : > { %v1619_v61 = vadd.f32 %v2564_v40, %v1613_v60  ;;  %v3317_v4 = vsel %vm1635_vm15, %v2604_v1, %v1634_v3 }
 0x5a3   : > { %v1621_v62 = vadd.f32 %v1619_v61, %v3209_v7 }
 0x5a5   : > { %v1627_v63 = vsel %vm1091_vm11, %v1621_v62, 0.0 }
 0x5a6   : > { %1628 = vadd.xlane.f32.xlu0 %v1627_v63 }
 0x611   : > { %v1626_v5 = vpop.xlane.xlu2 %1625 }
 0x612   : > { %v1637_v8 = vmul.f32 %v3317_v4, %v1626_v5 }
 0x614   : > { %v1639_v9 = vsub.f32 %v1620_v53, %v1637_v8 }
 0x616   : > { %v1641_v7 = vmul.f32 %v1639_v9, %v1639_v9 }
 0x618   : > { %v1643_v10 = vsel %vm1091_vm11, %v1641_v7, 0.0 }
 0x619   : > { %1644 = vadd.xlane.f32.xlu1 %v1643_v10  ;;  %v1629_v11 = vpop.xlane.xlu0 %1628 }
 0x61a   : > { %v1638_v12 = vmul.f32 %v3317_v4, %v1629_v11  ;;  %v2433_v11 = vld [vmem:[%s3163_s6 + $0x10] sm:$0xff] }
 0x61b   : > { %1857 = vmatpush.bf16.msrb.mxu2 %v2433_v11 }
 0x61c   : > { %v1640_v13 = vsub.f32 %v1621_v62, %v1638_v12 }
 0x61e   : > { %v1642_v49 = vmul.f32 %v1640_v13, %v1640_v13 }
 0x61f   : > { %1858 = vmatpush.bf16.msrb.mxu2 %v2432_v55 }
 0x620   : > { %v1646_v14 = vsel %vm1091_vm11, %v1642_v49, 0.0 }
 0x621   : > { %1647 = vadd.xlane.f32.xlu2 %v1646_v14 }
 0x68c   : > { %v1645_v16 = vpop.xlane.xlu1 %1644 }
 0x68d   : > { %v1649_v17 = vmul.f32 %v1645_v16, %v3317_v4 }
 0x68f   : > { %v1651_v18 = vadd.f32 1e-05, %v1649_v17 }
 0x691   : > { %2605 = vrsqrt.f32 %v1651_v18  ;;  %vm1659_vm1 = vweird.f32 %v1651_v18 }
 0x694   : > { %v1648_v51 = vpop.xlane.xlu2 %1647 }
 0x695   : > { %v1650_v19 = vmul.f32 %v1648_v51, %v3317_v4 }
 0x697   : > { %v2606_v20 = vpop.eup %2605  ;;  %v1652_v21 = vadd.f32 1e-05, %v1650_v19 }
 0x698   : > { %v1654_v22 = vmul.f32 %v2606_v20, %v1651_v18  ;;  %vm1660_vm0 = vweird.f32 %v2606_v20 }
 0x699   : > { %2607 = vrsqrt.f32 %v1652_v21  ;;  %vm1661_vm2 = vmor %vm1659_vm1, %vm1660_vm0  ;;  %vm1669_vm4 = vweird.f32 %v1652_v21  ;;  %vm1848_vm0 = vcmask 523264  }
 0x69a   : > { %v1655_v24 = vmul.f32 %v2606_v20, %v1654_v22  ;;  %v2431_v22 = vld [vmem:[%s3163_s6] sm:$0xff] }
 0x69b   : > { %1859 = vmatpush.bf16.msrb.mxu2 %v2431_v22 }
 0x69c   : > { %v1656_v23 = vmul.f32 0.5, %v1655_v24 }
 0x69e   : > { %v1657_v25 = vsub.f32 1.5, %v1656_v23 }
 0x69f   : > { %v2608_v26 = vpop.eup %2607 }
 0x6a0   : > { %v1658_v27 = vmul.f32 %v2606_v20, %v1657_v25  ;;  %v1664_v28 = vmul.f32 %v2608_v26, %v1652_v21  ;;  %vm1670_vm3 = vweird.f32 %v2608_v26 }
 0x6a1   : > { %vm1671_vm5 = vmor %vm1669_vm4, %vm1670_vm3 }
 0x6a2   : > { %v1665_v29 = vmul.f32 %v2608_v26, %v1664_v28  ;;  %v1662_v30 = vsel %vm1661_vm2, %v2606_v20, %v1658_v27 }
 0x6a3   : > { %v1673_v34 = vmul.f32 %v1662_v30, %v1639_v9 }
 0x6a4   : > { %v1666_v31 = vmul.f32 0.5, %v1665_v29 }
 0x6a5   : > { %v1678_v38 = vmul.f32 %v2565_v33, %v1673_v34 }
 0x6a6   : > { %v1667_v32 = vsub.f32 1.5, %v1666_v31 }
 0x6a7   : > { %v3337_v41 = vadd.f32 %v2566_v37, %v1678_v38 }
 0x6a8   : > { %v1668_v35 = vmul.f32 %v2608_v26, %v1667_v32 }
 0x6aa   : > { %v1672_v36 = vsel %vm1671_vm5, %v2608_v26, %v1668_v35 }
 0x6ab   : > { %v1674_v39 = vmul.f32 %v1672_v36, %v1640_v13 }
 0x6ad   : > { %v1679_v40 = vmul.f32 %v2565_v33, %v1674_v39 }
 0x6af   : > { %v3339_v42 = vadd.f32 %v2566_v37, %v1679_v40 }
 0x6b1   : > { %v1685_v43 = vpack.c.bf16 %v3339_v42, %v3337_v41 }
 0x6b3   : > { %2389 = vmatmul.msk.bf16.vlgmr.msrb.gmra.mxu1 %vm1091_vm11, %v1685_v43 }
 0x730   : > { %v1718_v45 = vpop.f32.mrf.mxu1 }
 0x731   : > { %v3349_v46 = vadd.f32 %v2567_v44, %v1718_v45 }
 0x733   : > { %v3352_v47 = vmul.f32 0.70710677, %v3349_v46 }
 0x735   : > { %v1727_v48 = vmul.f32 %v3352_v47, %v3352_v47 }
 0x737   : > { %v1728_v50 = vmin.f32 %v1727_v48, 16.0 }
 0x738   : > { %v1720_v52 = vpop.f32.mrf.mxu1 }
 0x739   : > { %v1729_v53 = vmul.f32 2.1237322e-06, %v1728_v50  ;;  %v1740_v54 = vmul.f32 3.8918573e-05, %v1728_v50  ;;  %v3356_v57 = vadd.f32 %v2567_v44, %v1720_v52 }
 0x73b   : > { %v1730_v58 = vadd.f32 0.00028619796, %v1729_v53  ;;  %v1741_v59 = vadd.f32 0.001143296, %v1740_v54  ;;  %v3359_v60 = vmul.f32 0.70710677, %v3356_v57 }
 0x73d   : > { %v1742_v61 = vmul.f32 %v1741_v59, %v1728_v50  ;;  %v1767_v62 = vmul.f32 %v3359_v60, %v3359_v60  ;;  %v1731_v63 = vmul.f32 %v1730_v58, %v1728_v50 }
 0x73f   : > { %v1743_v0 = vadd.f32 0.014752088, %v1742_v61  ;;  %v1768_v1 = vmin.f32 %v1767_v62, 16.0  ;;  %v1732_v5 = vadd.f32 0.0036580483, %v1731_v63 }
 0x741   : > { %v1744_v56 = vmul.f32 %v1743_v0, %v1728_v50  ;;  %v1769_v2 = vmul.f32 2.1237322e-06, %v1768_v1  ;;  %v1780_v3 = vmul.f32 3.8918573e-05, %v1768_v1  ;;  %v1733_v49 = vmul.f32 %v1732_v5, %v1728_v50 }
 0x743   : > { %v1745_v8 = vadd.f32 0.112945676, %v1744_v56  ;;  %v1770_v9 = vadd.f32 0.00028619796, %v1769_v2  ;;  %v1781_v7 = vadd.f32 0.001143296, %v1780_v3 }
 0x744   : > { %v1734_v51 = vadd.f32 0.05243302, %v1733_v49 }
 0x745   : > { %v1746_v10 = vmul.f32 %v1745_v8, %v1728_v50  ;;  %v1771_v12 = vmul.f32 %v1770_v9, %v1768_v1  ;;  %v1782_v13 = vmul.f32 %v1781_v7, %v1768_v1  ;;  %v1723_v9 = vmul.f32 0.5, %v3349_v46 }
 0x746   : > { %v1735_v23 = vmul.f32 %v1734_v51, %v1728_v50  ;;  %v1724_v7 = vmul.f32 0.5, %v3356_v57 }
 0x747   : > { %v1747_v14 = vadd.f32 0.4994258, %v1746_v10  ;;  %v1772_v15 = vadd.f32 0.0036580483, %v1771_v12  ;;  %v1783_v16 = vadd.f32 0.014752088, %v1782_v13 }
 0x748   : > { %v1736_v29 = vadd.f32 0.18741608, %v1735_v23 }
 0x749   : > { %v1748_v17 = vmul.f32 %v1747_v14, %v1728_v50  ;;  %v1784_v18 = vmul.f32 %v1783_v16, %v1768_v1  ;;  %v1773_v20 = vmul.f32 %v1772_v15, %v1768_v1 }
 0x74a   : > { %v1737_v34 = vmul.f32 %v1736_v29, %v1728_v50 }
 0x74b   : > { %v1749_v19 = vadd.f32 1.0, %v1748_v17  ;;  %v1785_v21 = vadd.f32 0.112945676, %v1784_v18  ;;  %v1774_v25 = vadd.f32 0.05243302, %v1773_v20 }
 0x74c   : > { %v1738_v40 = vadd.f32 1.1283791, %v1737_v34 }
 0x74d   : > { %2609 = vrcp.f32 %v1749_v19  ;;  %v1786_v24 = vmul.f32 %v1785_v21, %v1768_v1  ;;  %v1775_v31 = vmul.f32 %v1774_v25, %v1768_v1  ;;  %v1761_v36 = vand.u32 2147483648, %v1749_v19 }
 0x74e   : > { %v1759_v38 = vand.u32 2147483647, %v1749_v19  ;;  %vm1755_vm7 = vweird.f32 %v1749_v19  ;;  %v1739_v54 = vmul.f32 %v1738_v40, %v3352_v47 }
 0x74f   : > { %v1787_v26 = vadd.f32 0.4994258, %v1786_v24  ;;  %v1776_v37 = vadd.f32 0.18741608, %v1775_v31  ;;  %v1762_v45 = vor.u32 1.1754944e-38, %v1761_v36 }
 0x750   : > { %vm1760_vm9 = vcmp.eq.f32.partialorder %v1759_v38, 8.507059e+37 }
 0x751   : > { %v1788_v27 = vmul.f32 %v1787_v26, %v1768_v1  ;;  %v1777_v48 = vmul.f32 %v1776_v37, %v1768_v1 }
 0x753   : > { %v2610_v28 = vpop.eup %2609  ;;  %v1789_v32 = vadd.f32 1.0, %v1788_v27  ;;  %v1778_v50 = vadd.f32 1.1283791, %v1777_v48 }
 0x754   : > { %v1751_v30 = vmul.f32 %v2610_v28, %v1749_v19  ;;  %vm1756_vm6 = vweird.f32 %v2610_v28 }
 0x755   : > { %2611 = vrcp.f32 %v1789_v32  ;;  %vm1757_vm8 = vmor %vm1755_vm7, %vm1756_vm6  ;;  %v1801_v59 = vand.u32 2147483648, %v1789_v32  ;;  %v1799_v63 = vand.u32 2147483647, %v1789_v32  ;;  %vm1795_vm13 = vweird.f32 %v1789_v32 }
 0x756   : > { %v1752_v33 = vsub.f32 1.0, %v1751_v30  ;;  %v1779_v1 = vmul.f32 %v1778_v50, %v3359_v60  ;;  %v2568_v60 = vld [vmem:[%s3530_s13] ss:$0 sm:$0xff] }
 0x757   : > { %v1802_v56 = vor.u32 1.1754944e-38, %v1801_v59  ;;  %vm1800_vm15 = vcmp.eq.f32.partialorder %v1799_v63, 8.507059e+37 }
 0x758   : > { %v1753_v35 = vmul.f32 %v2610_v28, %v1752_v33 }
 0x75a   : > { %v1754_v39 = vadd.f32 %v2610_v28, %v1753_v35 }
 0x75b   : > { %v2612_v43 = vpop.eup %2611 }
 0x75c   : > { %v1758_v44 = vsel %vm1757_vm8, %v2610_v28, %v1754_v39  ;;  %v1791_v52 = vmul.f32 %v2612_v43, %v1789_v32  ;;  %vm1796_vm10 = vweird.f32 %v2612_v43  ;;  %v2569_v39 = vld [vmem:[%s948_s0] ss:$0 sm:$0xff] }
 0x75d   : > { %v1763_v53 = vsel %vm1760_vm9, %v1762_v45, %v1758_v44  ;;  %vm1797_vm14 = vmor %vm1795_vm13, %vm1796_vm10  ;;  %v2570_v44 = vld [vmem:[%s3531_s24] ss:$0 sm:$0xff] }
 0x75e   : > { %v1792_v58 = vsub.f32 1.0, %v1791_v52  ;;  %v1764_v61 = vmul.f32 %v1763_v53, %v1739_v54 }
 0x760   : > { %v1793_v62 = vmul.f32 %v2612_v43, %v1792_v58  ;;  %v2390_v6 = vclamps-f32 %v1764_v61, 1.0 }
 0x762   : > { %v1794_v0 = vadd.f32 %v2612_v43, %v1793_v62  ;;  %v1807_v47 = vadd.f32 1.0, %v2390_v6 }
 0x764   : > { %v1798_v2 = vsel %vm1797_vm14, %v2612_v43, %v1794_v0  ;;  %v1809_v11 = vmul.f32 %v1807_v47, %v1723_v9 }
 0x765   : > { %v1803_v3 = vsel %vm1800_vm15, %v1802_v56, %v1798_v2 }
 0x766   : > { %v1804_v5 = vmul.f32 %v1803_v3, %v1779_v1 }
 0x768   : > { %v2391_v8 = vclamps-f32 %v1804_v5, 1.0 }
 0x76a   : > { %v1808_v10 = vadd.f32 1.0, %v2391_v8 }
 0x76c   : > { %v1810_v12 = vmul.f32 %v1808_v10, %v1724_v7 }
 0x76e   : > { %v1811_v13 = vpack.c.bf16 %v1810_v12, %v1809_v11 }
 0x770   : > { %2408 = vmatmul.msk.bf16.vlgmr.msrb.gmra.mxu2 %vm1848_vm0, %v1811_v13 }
 0x7f3   : > { %v1861_v49 = vpop.f32.mrf.mxu2 }
 0x7f4   : > { %v1862_v14 = vadd.f32 %v2568_v60, %v1861_v49 }
 0x7f6   : > { %v1866_v15 = vadd.f32 %v1862_v14, %v3337_v41 }
 0x7f8   : > { %v1870_v16 = vsel %vm1091_vm11, %v1866_v15, 0.0 }
 0x7f9   : > { %1871 = vadd.xlane.f32.xlu0 %v1870_v16 }
 0x7fb   : > { %v1863_v46 = vpop.f32.mrf.mxu2 }
 0x7fc   : > { %v1864_v57 = vadd.f32 %v2568_v60, %v1863_v46 }
 0x7fe   : > { %v1867_v17 = vadd.f32 %v1864_v57, %v3339_v42 }
 0x800   : > { %v1873_v55 = vsel %vm1091_vm11, %v1867_v17, 0.0 }
 0x801   : > { %1874 = vadd.xlane.f32.xlu2 %v1873_v55 }
 0x86c   : > { %v1872_v18 = vpop.xlane.xlu0 %1871 }
 0x86d   : > { %v1876_v51 = vmul.f32 %v1872_v18, %v3317_v4 }
 0x86f   : > { %v1878_v19 = vsub.f32 %v1866_v15, %v1876_v51 }
 0x871   : > { %v1880_v20 = vmul.f32 %v1878_v19, %v1878_v19 }
 0x873   : > { %v1882_v21 = vsel %vm1091_vm11, %v1880_v20, 0.0 }
 0x874   : > { %v1875_v22 = vpop.xlane.xlu2 %1874  ;;  %1883 = vadd.xlane.f32.xlu0 %v1882_v21 }
 0x875   : > { %v1877_v41 = vmul.f32 %v1875_v22, %v3317_v4 }
 0x877   : > { %v1879_v24 = vsub.f32 %v1867_v17, %v1877_v41 }
 0x879   : > { %v1881_v23 = vmul.f32 %v1879_v24, %v1879_v24 }
 0x87b   : > { %v1885_v25 = vsel %vm1091_vm11, %v1881_v23, 0.0 }
 0x87c   : > { %1886 = vadd.xlane.f32.xlu2 %v1885_v25 }
 0x8e7   : > { %v1884_v42 = vpop.xlane.xlu0 %1883 }
 0x8e8   : > { %v1888_v26 = vmul.f32 %v1884_v42, %v3317_v4 }
 0x8ea   : > { %v1890_v27 = vadd.f32 1e-05, %v1888_v26 }
 0x8ec   : > { %2613 = vrsqrt.f32 %v1890_v27  ;;  %vm1898_vm2 = vweird.f32 %v1890_v27 }
 0x8ef   : > { %v1887_v28 = vpop.xlane.xlu2 %1886 }
 0x8f0   : > { %v1889_v29 = vmul.f32 %v1887_v28, %v3317_v4 }
 0x8f2   : > { %v2614_v30 = vpop.eup %2613  ;;  %v1891_v31 = vadd.f32 1e-05, %v1889_v29 }
 0x8f3   : > { %v1893_v32 = vmul.f32 %v2614_v30, %v1890_v27  ;;  %vm1899_vm1 = vweird.f32 %v2614_v30 }
 0x8f4   : > { %2615 = vrsqrt.f32 %v1891_v31  ;;  %vm1900_vm3 = vmor %vm1898_vm2, %vm1899_vm1  ;;  %vm1908_vm5 = vweird.f32 %v1891_v31 }
 0x8f5   : > { %v1894_v33 = vmul.f32 %v2614_v30, %v1893_v32 }
 0x8f7   : > { %v1895_v34 = vmul.f32 0.5, %v1894_v33 }
 0x8f9   : > { %v1896_v35 = vsub.f32 1.5, %v1895_v34 }
 0x8fa   : > { %v2616_v36 = vpop.eup %2615 }
 0x8fb   : > { %v1897_v37 = vmul.f32 %v2614_v30, %v1896_v35  ;;  %v1903_v38 = vmul.f32 %v2616_v36, %v1891_v31  ;;  %vm1909_vm4 = vweird.f32 %v2616_v36 }
 0x8fc   : > { %vm1910_vm6 = vmor %vm1908_vm5, %vm1909_vm4 }
 0x8fd   : > { %v1901_v40 = vsel %vm1900_vm3, %v2614_v30, %v1897_v37  ;;  %v1904_v43 = vmul.f32 %v2616_v36, %v1903_v38 }
 0x8fe   : > { %v1912_v45 = vmul.f32 %v1901_v40, %v1878_v19 }
 0x8ff   : > { %v1905_v48 = vmul.f32 0.5, %v1904_v43 }
 0x900   : > { %v1917_v52 = vmul.f32 %v2569_v39, %v1912_v45 }
 0x901   : > { %v1906_v53 = vsub.f32 1.5, %v1905_v48 }
 0x902   : > { %v1922_v54 = vadd.f32 %v2570_v44, %v1917_v52 }
 0x903   : > { %v1907_v58 = vmul.f32 %v2616_v36, %v1906_v53 }
 0x904   : > { %1924 = vst.msk [vmem:[#allocation2] sm:$0xff] %vm1091_vm11, %v1922_v54 }
 0x905   : > { %v1911_v50 = vsel %vm1910_vm6, %v2616_v36, %v1907_v58 }
 0x906   : > { %v1913_v59 = vmul.f32 %v1911_v50, %v1879_v24 }
 0x908   : > { %v1918_v61 = vmul.f32 %v2569_v39, %v1913_v59  ;;  %1929 = sbr.rel (%p2409_p5) target bundleno = 2737 (0xab1), region = 128 }
 0x90a   : > { %v1923_v62 = vadd.f32 %v2570_v44, %v1918_v61 }
 0x90c   : > { %1925 = vst.msk [vmem:[#allocation2 + $0x8] sm:$0xff] %vm1091_vm11, %v1923_v62 }
 0x90d   : > { %v1930_v63 = vld [vmem:[#allocation2] sm:$0xff]  ;;  %v2436_v12 = vld [vmem:[%s3533_s19 + $0x8] sm:$0xff]  ;;  %v2618_v29 = vld [vmem:[#allocation10] ss:$0 sm:$0xff] }
 0x90e   : > { %v1934_v0 = vsel %vm1091_vm11, %v1930_v63, 0.0  ;;  %2018 = vmatpush.bf16.msra.mxu0 %v2436_v12  ;;  %v2435_v60 = vld [vmem:[%s3533_s19] sm:$0xff]  ;;  %v2619_v34 = vld [vmem:[#allocation12] ss:$0 sm:$0xff]  ;;  %v2620_v35 = vld [vmem:[#allocation4] ss:$0 sm:$0xff] }
 0x90f   : > { %1935 = vadd.xlane.f32.xlu0 %v1934_v0  ;;  %v2621_v38 = vld [vmem:[#allocation3] ss:$0 sm:$0xff] }
 0x912   : > { %2019 = vmatpush.bf16.msra.mxu0 %v2435_v60 }
 0x913   : > { %v1931_v56 = vld [vmem:[#allocation2 + $0x8] sm:$0xff] }
 0x914   : > { %v1937_v6 = vsel %vm1091_vm11, %v1931_v56, 0.0 }
 0x917   : > { %1938 = vadd.xlane.f32.xlu0 %v1937_v6 }
 0x982   : > { %v1936_v1 = vpop.xlane.xlu0 %1935 }
 0x983   : > { %v1940_v2 = vmul.f32 %v1936_v1, %v3317_v4 }
 0x985   : > { %v1942_v3 = vsub.f32 %v1930_v63, %v1940_v2 }
 0x987   : > { %v1944_v5 = vmul.f32 %v1942_v3, %v1942_v3 }
 0x989   : > { %v1946_v47 = vsel %vm1091_vm11, %v1944_v5, 0.0 }
 0x98a   : > { %1947 = vadd.xlane.f32.xlu1 %v1946_v47  ;;  %v1939_v8 = vpop.xlane.xlu0 %1938 }
 0x98b   : > { %v1941_v9 = vmul.f32 %v1939_v8, %v3317_v4 }
 0x98d   : > { %v1943_v7 = vsub.f32 %v1931_v56, %v1941_v9 }
 0x98f   : > { %v1945_v10 = vmul.f32 %v1943_v7, %v1943_v7 }
 0x991   : > { %v1949_v11 = vsel %vm1091_vm11, %v1945_v10, 0.0 }
 0x992   : > { %1950 = vadd.xlane.f32.xlu1 %v1949_v11 }
 0x9fd   : > { %v1948_v13 = vpop.xlane.xlu1 %1947 }
 0x9fe   : > { %v1952_v49 = vmul.f32 %v1948_v13, %v3317_v4 }
 0xa00   : > { %v1954_v14 = vadd.f32 1e-05, %v1952_v49 }
 0xa02   : > { %2622 = vrsqrt.f32 %v1954_v14  ;;  %vm1962_vm8 = vweird.f32 %v1954_v14 }
 0xa05   : > { %v1951_v15 = vpop.xlane.xlu1 %1950 }
 0xa06   : > { %v1953_v16 = vmul.f32 %v1951_v15, %v3317_v4  ;;  %v2617_v4 = vld [vmem:[#allocation9] ss:$0 sm:$0xff] }
 0xa08   : > { %v2623_v46 = vpop.eup %2622  ;;  %v1955_v57 = vadd.f32 1e-05, %v1953_v16 }
 0xa09   : > { %v1957_v17 = vmul.f32 %v2623_v46, %v1954_v14  ;;  %vm1963_vm7 = vweird.f32 %v2623_v46 }
 0xa0a   : > { %2624 = vrsqrt.f32 %v1955_v57  ;;  %vm1964_vm9 = vmor %vm1962_vm8, %vm1963_vm7  ;;  %vm1972_vm13 = vweird.f32 %v1955_v57 }
 0xa0b   : > { %v1958_v55 = vmul.f32 %v2623_v46, %v1957_v17 }
 0xa0d   : > { %v1959_v18 = vmul.f32 0.5, %v1958_v55 }
 0xa0f   : > { %v1960_v51 = vsub.f32 1.5, %v1959_v18 }
 0xa10   : > { %v2625_v19 = vpop.eup %2624 }
 0xa11   : > { %v1961_v20 = vmul.f32 %v2623_v46, %v1960_v51  ;;  %v1967_v21 = vmul.f32 %v2625_v19, %v1955_v57  ;;  %vm1973_vm10 = vweird.f32 %v2625_v19 }
 0xa12   : > { %vm1974_vm14 = vmor %vm1972_vm13, %vm1973_vm10 }
 0xa13   : > { %v1968_v22 = vmul.f32 %v2625_v19, %v1967_v21  ;;  %v1965_v24 = vsel %vm1964_vm9, %v2623_v46, %v1961_v20 }
 0xa14   : > { %v1976_v25 = vmul.f32 %v1965_v24, %v1942_v3 }
 0xa15   : > { %v1969_v41 = vmul.f32 0.5, %v1968_v22 }
 0xa16   : > { %v1981_v28 = vmul.f32 %v2617_v4, %v1976_v25 }
 0xa17   : > { %v1970_v23 = vsub.f32 1.5, %v1969_v41 }
 0xa18   : > { %v1986_v31 = vadd.f32 %v2618_v29, %v1981_v28 }
 0xa19   : > { %v1971_v42 = vmul.f32 %v2625_v19, %v1970_v23 }
 0xa1b   : > { %v1975_v26 = vsel %vm1974_vm14, %v2625_v19, %v1971_v42 }
 0xa1c   : > { %v1977_v27 = vmul.f32 %v1975_v26, %v1943_v7 }
 0xa1e   : > { %v1982_v30 = vmul.f32 %v2617_v4, %v1977_v27 }
 0xa20   : > { %v1987_v32 = vadd.f32 %v2618_v29, %v1982_v30 }
 0xa22   : > { %v1988_v33 = vpack.c.bf16 %v1987_v32, %v1986_v31 }
 0xa24   : > { %2418 = vmatmul.msk.bf16.vlgmr.msra.gmra.mxu0 %vm1091_vm11, %v1988_v33 }
 0xaa1   : > { %v2021_v36 = vpop.f32.mrf.mxu0 }
 0xaa2   : > { %v2022_v37 = vadd.f32 %v2619_v34, %v2021_v36 }
 0xaa4   : > { %v2030_v39 = vmul.f32 %v2620_v35, %v2022_v37 }
 0xaa6   : > { %v2036_v40 = vadd.f32 %v2621_v38, %v2030_v39 }
 0xaa8   : > { %2038 = vst.msk [vmem:[%s3180_s29] sm:$0xff] %vm1165_vm12, %v2036_v40 }
 0xaa9   : > { %v2023_v43 = vpop.f32.mrf.mxu0 }
 0xaaa   : > { %v2024_v44 = vadd.f32 %v2619_v34, %v2023_v43 }
 0xaac   : > { %v2031_v45 = vmul.f32 %v2620_v35, %v2024_v44 }
 0xaae   : > { %v2037_v48 = vadd.f32 %v2621_v38, %v2031_v45 }
 0xab0   : > { %2039 = vst.msk [vmem:[%s3180_s29 + $0x8] sm:$0xff] %vm1165_vm12, %v2037_v48 }
 0xab1 PF: > { %s3534_s4 = sld [smem:[#allocation21_spill]] }
 0xab2   : > { %s3535_s2 = sld [smem:[#allocation17_spill]] }
 0xab3   : > { %s3536_s25 = sld [smem:[#allocation18_spill]] }
 0xab4   : > { %s3537_s26 = sld [smem:[#allocation24_spill]] }
 0xab5   : > { %s3538_s27 = sld [smem:[#allocation19_spill]] }
 0xab6   : > { %s3539_s3 = sld [smem:[#allocation20_spill]] }
 0xab7   : > { %s37_s0 = sadd.s32 1, %s3534_s4   ;;  %s3540_s28 = sld [smem:[#allocation22_spill]] }
 0xab8   : > { %p34_p6 = scmp.ge.s32.totalorder %s37_s0, 6   ;;  %s3541_s29 = sld [smem:[#allocation23_spill]] }
 0xaba   :  { %36 = sbr.rel (!%p34_p6) target bundleno = 28 (0x1c), region = 213 }
 0xabf   :  { %2085 = vsyncpa [#allocation6], 1 }
 0xac0   :  { %2087 = vsyncpa [#allocation6 + $0x1], 1 }
 0xac1   :  { %2088 = vsyncpa [#allocation8], 1 }
 0xac2   :  { %2090 = vsyncpa [#allocation8 + $0x1], 1 }
 0xac3   :  { %2091 = vsyncpa [#allocation11], 1 }

</bundles_post_ra>
